<compile_context>
chip_gen: v6e
topology: v6e:2x2x1
jax: 0.10.0
libtpu: 0.0.40
codegen_flags: <defaults>
</compile_context>

<pallas_src>
import functools
import math

import jax
import jax.numpy as jnp
from jax.experimental import pallas as pl
from jax.experimental.pallas import tpu as pltpu


CFG = dict(
    vocab=100,
    hidden=32,
    heads=2,
    layers=2,
    intermediate=64,
    max_pos=16,
    type_vocab=2,
    num_videos=10,   # len(load_video_mapping(...)) replaced by a synthetic count
)

LANE = 128


# ---------------------------------------------------------------------------
# In-kernel math helpers (f32)
# ---------------------------------------------------------------------------

def _erf(x):
    # Abramowitz & Stegun 7.1.26 polynomial (|err| < 1.5e-7 in f32) — matches exact-erf GELU.
    a1, a2, a3, a4, a5 = 0.254829592, -0.284496736, 1.421413741, -1.453152027, 1.061405429
    p = 0.3275911
    s = jnp.where(x >= 0.0, 1.0, -1.0)
    ax = jnp.abs(x)
    t = 1.0 / (1.0 + p * ax)
    poly = ((((a5 * t + a4) * t + a3) * t + a2) * t + a1) * t
    return s * (1.0 - poly * jnp.exp(-ax * ax))


def _gelu(x):
    return 0.5 * x * (1.0 + _erf(x * (1.0 / math.sqrt(2.0))))


def _layernorm(x, g, b):
    mean = jnp.mean(x, axis=-1, keepdims=True)
    xc = x - mean
    var = jnp.mean(xc * xc, axis=-1, keepdims=True)
    return xc * jax.lax.rsqrt(var + 1e-12) * g + b


# ---------------------------------------------------------------------------
# The fused whole-forward kernel (grid axis = encoder layer)
# ---------------------------------------------------------------------------

def _qtv_kernel(x0_hbm, mask_ref, embln_ref,
                wqkv_ref, wo_ref, wi_ref, wo2_ref, vecs_ref,
                pool_b_ref, cls_b_ref, pw_hbm, cw_hbm,
                out_ref,
                x_vmem, pw_vmem, cw_vmem, sem,
                *, B, S, H, I, nh, dh):
    l = pl.program_id(0)
    nl = pl.num_programs(0)

    # Layer 0: DMA the summed embeddings HBM -> resident VMEM buffer, LayerNorm in place.
    # (x0 is not pinned in VMEM for the rest of the grid.)
    @pl.when(l == 0)
    def _():
        cp = pltpu.make_async_copy(x0_hbm, x_vmem, sem.at[0])
        cp.start()
        cp.wait()
        x_vmem[...] = _layernorm(x_vmem[...], embln_ref[0:1, :], embln_ref[1:2, :])

    # Last layer: start prefetching the pooler / classifier weights so the DMA overlaps
    # this layer's compute; wait just before the pooler below.
    @pl.when(l == nl - 1)
    def _():
        pltpu.make_async_copy(pw_hbm, pw_vmem, sem.at[1]).start()
        pltpu.make_async_copy(cw_hbm, cw_vmem, sem.at[2]).start()

    x = x_vmem[...]                                            # [B*S, H] f32
    x_bf = x.astype(jnp.bfloat16)

    # Packed per-layer vectors: [bqkv(3H) | bo(H) | g1 | b1 | bi(I) | bo2 | g2 | b2]
    vecs = vecs_ref[...]                                       # [8, W] f32
    bqkv = vecs[0:1, :3 * H]
    bo   = vecs[1:2, :H]
    g1   = vecs[2:3, :H]
    b1   = vecs[3:4, :H]
    bi   = vecs[4:5, :I]
    bo2  = vecs[5:6, :H]
    g2   = vecs[6:7, :H]
    b2   = vecs[7:8, :H]

    # --- fused QKV projection (1/sqrt(dh) already folded into the Q weight/bias) ---
    qkv = jnp.dot(x_bf, wqkv_ref[...], preferred_element_type=jnp.float32) + bqkv   # [N, 3H]

    # --- head-batched attention: split heads once, single batched matmuls over (nh*B) ---
    def split_heads(z2d):                                      # [N, H] -> [nh*B, S, dh]
        return jnp.concatenate(
            [z2d[:, h * dh:(h + 1) * dh].reshape(B, S, dh) for h in range(nh)], axis=0)

    qh = split_heads(qkv[:, :H]).astype(jnp.bfloat16)
    kh = split_heads(qkv[:, H:2 * H]).astype(jnp.bfloat16)
    vh = split_heads(qkv[:, 2 * H:3 * H]).astype(jnp.bfloat16)

    s = jnp.einsum("bqd,bkd->bqk", qh, kh,
                   preferred_element_type=jnp.float32)         # [nh*B, S, S]
    mask = jnp.concatenate([mask_ref[...]] * nh, axis=0)       # [nh*B, 1, S] (head-major batch)
    s = s + mask                                               # broadcast over query dim
    s = s - jnp.max(s, axis=-1, keepdims=True)
    p = jnp.exp(s)
    p = p * pl.reciprocal(jnp.sum(p, axis=-1, keepdims=True), approx=True)
    ctx = jnp.einsum("bqk,bkd->bqd", p.astype(jnp.bfloat16), vh,
                     preferred_element_type=jnp.float32)       # [nh*B, S, dh]

    # merge heads (one lane concat) and do ONE K=H output projection
    ctx2d = jnp.concatenate(
        [ctx[h * B:(h + 1) * B].reshape(B * S, dh) for h in range(nh)], axis=-1)  # [N, H]
    attn_out = jnp.dot(ctx2d.astype(jnp.bfloat16), wo_ref[...],
                       preferred_element_type=jnp.float32) + bo

    # --- residual + LN ---
    x = _layernorm(attn_out + x, g1, b1)

    # --- FFN with fused GELU, then residual + LN ---
    h1 = _gelu(jnp.dot(x.astype(jnp.bfloat16), wi_ref[...],
                       preferred_element_type=jnp.float32) + bi)
    ffn = jnp.dot(h1.astype(jnp.bfloat16), wo2_ref[...],
                  preferred_element_type=jnp.float32) + bo2
    x = _layernorm(ffn + x, g2, b2)
    x_vmem[...] = x

    # --- last layer: BertPooler (dense + tanh on [CLS]) + video-id classifier ---
    @pl.when(l == nl - 1)
    def _():
        pltpu.make_async_copy(pw_hbm, pw_vmem, sem.at[1]).wait()
        pltpu.make_async_copy(cw_hbm, cw_vmem, sem.at[2]).wait()
        cls_tok = x.reshape(B, S, H)[:, 0, :]                  # [B, H]
        pooled = jnp.tanh(jnp.dot(cls_tok.astype(jnp.bfloat16), pw_vmem[...],
                                  preferred_element_type=jnp.float32) + pool_b_ref[...])
        out_ref[...] = jnp.dot(pooled.astype(jnp.bfloat16), cw_vmem[...],
                               preferred_element_type=jnp.float32) + cls_b_ref[...]


# ---------------------------------------------------------------------------
# Parameters: synthetic init + kernel-friendly packing
# ---------------------------------------------------------------------------

def init_params(key, cfg):
    # TODO(synk): BertModel.from_pretrained('bert-base-uncased') checkpoint load replaced
    # by deterministic synthetic initialization (same parameter structure/shapes, scaled down).
    H, I = cfg["hidden"], cfg["intermediate"]
    keys = iter(jax.random.split(key, 256))

    def rnd(shape):
        return (jax.random.normal(next(keys), shape, jnp.float32) * 0.02).astype(jnp.float32)

    params = dict(
        word_emb=rnd((cfg["vocab"], H)),
        pos_emb=rnd((cfg["max_pos"], H)),
        type_emb=rnd((cfg["type_vocab"], H)),
        emb_ln_g=jnp.ones((H,), jnp.float32),
        emb_ln_b=jnp.zeros((H,), jnp.float32),
        pool_w=rnd((H, H)),
        pool_b=jnp.zeros((H,), jnp.float32),
        cls_w=rnd((H, cfg["num_videos"])),
        cls_b=jnp.zeros((cfg["num_videos"],), jnp.float32),
        layers=[],
    )
    for _ in range(cfg["layers"]):
        params["layers"].append(dict(
            wq=rnd((H, H)), bq=jnp.zeros((H,), jnp.float32),
            wk=rnd((H, H)), bk=jnp.zeros((H,), jnp.float32),
            wv=rnd((H, H)), bv=jnp.zeros((H,), jnp.float32),
            wo=rnd((H, H)), bo=jnp.zeros((H,), jnp.float32),
            ln1_g=jnp.ones((H,), jnp.float32), ln1_b=jnp.zeros((H,), jnp.float32),
            wi=rnd((H, I)), bi=jnp.zeros((I,), jnp.float32),
            wo2=rnd((I, H)), bo2=jnp.zeros((H,), jnp.float32),
            ln2_g=jnp.ones((H,), jnp.float32), ln2_b=jnp.zeros((H,), jnp.float32),
        ))
    return params


def prep_params(params, cfg):
    """Stack per-layer weights along a leading layer axis, fuse QKV, fold the attention scale
    into Q, pack the ten tiny per-layer vectors into one [L, 8, W] array, cast matmul weights
    to bf16, and lane-pad the classifier to a multiple of 128 outputs."""
    H, I = cfg["hidden"], cfg["intermediate"]
    nh = cfg["heads"]
    dh = H // nh
    scale = 1.0 / math.sqrt(dh)
    pad = ((cfg["num_videos"] + LANE - 1) // LANE) * LANE
    W = ((max(3 * H, I) + LANE - 1) // LANE) * LANE

    def stack(fn):
        return jnp.stack([fn(lyr) for lyr in params["layers"]])

    wqkv = stack(lambda l: jnp.concatenate([l["wq"] * scale, l["wk"], l["wv"]], axis=1))

    def pack_vecs(l):
        rows = [
            jnp.concatenate([l["bq"] * scale, l["bk"], l["bv"]]),   # 3H  fused QKV bias
            l["bo"], l["ln1_g"], l["ln1_b"],                        # H
            l["bi"],                                                # I
            l["bo2"], l["ln2_g"], l["ln2_b"],                       # H
        ]
        out = jnp.zeros((8, W), jnp.float32)
        for i, r in enumerate(rows):
            out = out.at[i, :r.shape[0]].set(r)
        return out

    cls_w = jnp.zeros((H, pad), jnp.float32).at[:, :cfg["num_videos"]].set(params["cls_w"])
    cls_b = jnp.zeros((1, pad), jnp.float32).at[:, :cfg["num_videos"]].set(params["cls_b"][None, :])

    return dict(
        pad=pad, vec_w=W,
        emb_ln=jnp.stack([params["emb_ln_g"], params["emb_ln_b"]]),      # [2, H]
        wqkv=wqkv.astype(jnp.bfloat16),
        wo=stack(lambda l: l["wo"]).astype(jnp.bfloat16),
        wi=stack(lambda l: l["wi"]).astype(jnp.bfloat16),
        wo2=stack(lambda l: l["wo2"]).astype(jnp.bfloat16),
        vecs=stack(pack_vecs),                                           # [L, 8, W]
        pool_w=params["pool_w"].astype(jnp.bfloat16),
        pool_b=params["pool_b"][None, :],
        cls_w=cls_w.astype(jnp.bfloat16),
        cls_b=cls_b,
    )


# ---------------------------------------------------------------------------
# Forward pass: embedding gathers in glue + one fused pallas_call
# ---------------------------------------------------------------------------

def question_to_video_forward(params, prep, input_ids, attention_mask, cfg=CFG):
    B, S = input_ids.shape
    H, nh, L, I = cfg["hidden"], cfg["heads"], cfg["layers"], cfg["intermediate"]
    dh = H // nh
    N = B * S
    pad = prep["pad"]
    W = prep["vec_w"]

    # --- BertEmbeddings gathers (glue); token_type_ids == 0 ---
    word = params["word_emb"][input_ids]                                   # [B,S,H]
    pos = params["pos_emb"][jnp.arange(S)][None, :, :]                     # [1,S,H]
    typ = params["type_emb"][0][None, None, :]                             # [1,1,H]
    x0 = (word + pos + typ).reshape(N, H).astype(jnp.float32)

    # compact additive mask [B,1,S]; head/query broadcast happens inside the kernel
    mask_add = ((1.0 - attention_mask.astype(jnp.float32)) * -10000.0)[:, None, :]

    kernel = functools.partial(_qtv_kernel, B=B, S=S, H=H, I=I, nh=nh, dh=dh)

    def full(shape):
        return pl.BlockSpec(shape, lambda l, n=len(shape): (0,) * n)

    def per_layer(shape):
        return pl.BlockSpec((None,) + shape, lambda l, n=len(shape): (l,) + (0,) * n)

    grid_spec = pltpu.PrefetchScalarGridSpec(
        num_scalar_prefetch=0,
        grid=(L,),
        in_specs=[
            pl.BlockSpec(memory_space=pl.ANY),      # x0: stays in HBM, DMA'd once at layer 0
            full((B, 1, S)),                        # additive attention mask
            full((2, H)),                           # embedding LN gamma/beta (packed)
            per_layer((H, 3 * H)),                  # fused QKV weight (Q scale folded)
            per_layer((H, H)),                      # attention output projection weight
            per_layer((H, I)),                      # FFN in weight
            per_layer((I, H)),                      # FFN out weight
            per_layer((8, W)),                      # packed per-layer biases / LN params
            full((1, H)),                           # pooler bias
            full((1, pad)),                         # classifier bias (lane-padded)
            pl.BlockSpec(memory_space=pl.ANY),      # pooler weight (prefetched at last layer)
            pl.BlockSpec(memory_space=pl.ANY),      # classifier weight (prefetched at last layer)
        ],
        out_specs=pl.BlockSpec((B, pad), lambda l: (0, 0)),
        scratch_shapes=[
            pltpu.VMEM((N, H), jnp.float32),        # resident activation buffer
            pltpu.VMEM((H, H), jnp.bfloat16),       # pooler weight landing buffer
            pltpu.VMEM((H, pad), jnp.bfloat16),     # classifier weight landing buffer
            pltpu.SemaphoreType.DMA((3,)),          # x0 copy + pooler/classifier prefetch
        ],
    )

    logits_pad = pl.pallas_call(
        kernel,
        out_shape=jax.ShapeDtypeStruct((B, pad), jnp.float32),
        grid_spec=grid_spec,
        compiler_params=pltpu.CompilerParams(
            dimension_semantics=("arbitrary",),
            vmem_limit_bytes=32 * 1024 * 1024,
        ),
    )(x0, mask_add, prep["emb_ln"],
      prep["wqkv"], prep["wo"], prep["wi"], prep["wo2"], prep["vecs"],
      prep["pool_b"], prep["cls_b"], prep["pool_w"], prep["cls_w"])

    return logits_pad[:, :cfg["num_videos"]]                               # [B, num_videos]


# ---------------------------------------------------------------------------
# Main
# ---------------------------------------------------------------------------

if __name__ == "__main__":
    key = jax.random.PRNGKey(0)
    kp, ki = jax.random.split(key)

    params = init_params(kp, CFG)
    prep = prep_params(params, CFG)

    B, S = 2, 8
    input_ids = jax.random.randint(ki, (B, S), 0, CFG["vocab"], dtype=jnp.int32)
    # second example padded: last 3 tokens masked out
    attention_mask = jnp.array(
        [[1, 1, 1, 1, 1, 1, 1, 1],
         [1, 1, 1, 1, 1, 0, 0, 0]], dtype=jnp.int32)

    logits = question_to_video_forward(params, prep, input_ids, attention_mask)
    logits = jax.block_until_ready(logits)

    assert logits.shape == (B, CFG["num_videos"])
    assert bool(jnp.all(jnp.isfinite(logits)))
    print("KERNEL_OK")
</pallas_src>

<mosaic_0001>
module attributes {stable_mosaic.version = 11 : i64} {
  func.func @_qtv_kernel(%arg0: i32, %arg1: memref<16x32xf32, #tpu.memory_space<any>>, %arg2: memref<2x1x8xf32, #tpu.memory_space<vmem>>, %arg3: memref<2x32xf32, #tpu.memory_space<vmem>>, %arg4: memref<1x32x96xbf16, #tpu.memory_space<vmem>>, %arg5: memref<1x32x32xbf16, #tpu.memory_space<vmem>>, %arg6: memref<1x32x64xbf16, #tpu.memory_space<vmem>>, %arg7: memref<1x64x32xbf16, #tpu.memory_space<vmem>>, %arg8: memref<1x8x128xf32, #tpu.memory_space<vmem>>, %arg9: memref<1x32xf32, #tpu.memory_space<vmem>>, %arg10: memref<1x128xf32, #tpu.memory_space<vmem>>, %arg11: memref<32x32xbf16, #tpu.memory_space<any>>, %arg12: memref<32x128xbf16, #tpu.memory_space<any>>, %arg13: memref<2x128xf32, #tpu.memory_space<vmem>>, %arg14: memref<16x32xf32, #tpu.memory_space<vmem>>, %arg15: memref<32x32xbf16, #tpu.memory_space<vmem>>, %arg16: memref<32x128xbf16, #tpu.memory_space<vmem>>, %arg17: memref<3x!tpu.dma_semaphore, #tpu.memory_space<semaphore_mem>>) attributes {dimension_semantics = [#tpu.dimension_semantics<arbitrary>], iteration_bounds = array<i64: 2>, scalar_prefetch = 0 : i64, scratch_operands = 4 : i64, tpu.core_type = #tpu.core_type<tc>, window_params = [{}, {pipeline_mode = #tpu.pipeline_mode<synchronous>, transform_indices = @transform_1, window_bounds = array<i64: 2, 1, 8>}, {pipeline_mode = #tpu.pipeline_mode<synchronous>, transform_indices = @transform_2, window_bounds = array<i64: 2, 32>}, {transform_indices = @transform_3, window_bounds = array<i64: 1, 32, 96>}, {transform_indices = @transform_4, window_bounds = array<i64: 1, 32, 32>}, {transform_indices = @transform_5, window_bounds = array<i64: 1, 32, 64>}, {transform_indices = @transform_6, window_bounds = array<i64: 1, 64, 32>}, {transform_indices = @transform_7, window_bounds = array<i64: 1, 8, 128>}, {pipeline_mode = #tpu.pipeline_mode<synchronous>, transform_indices = @transform_8, window_bounds = array<i64: 1, 32>}, {pipeline_mode = #tpu.pipeline_mode<synchronous>, transform_indices = @transform_9, window_bounds = array<i64: 1, 128>}, {}, {}, {pipeline_mode = #tpu.pipeline_mode<synchronous>, transform_indices = @transform_12, window_bounds = array<i64: 2, 128>}]} {
    %c0_i32 = arith.constant 0 : i32
    %0 = arith.cmpi eq, %arg0, %c0_i32 : i32
    %1 = arith.extui %0 : i1 to i32
    %c0_i32_0 = arith.constant 0 : i32
    %2 = arith.cmpi ne, %1, %c0_i32_0 : i32
    scf.if %2 {
      %c0_i32_58 = arith.constant 0 : i32
      %171 = tpu.memref_slice %arg17[%c0_i32_58] : memref<3x!tpu.dma_semaphore, #tpu.memory_space<semaphore_mem>> -> memref<1x!tpu.dma_semaphore, #tpu.memory_space<semaphore_mem>>
      %172 = tpu.memref_squeeze %171 : memref<1x!tpu.dma_semaphore, #tpu.memory_space<semaphore_mem>> -> memref<!tpu.dma_semaphore, #tpu.memory_space<semaphore_mem>>
      tpu.enqueue_dma source(%arg1 : memref<16x32xf32, #tpu.memory_space<any>>) target(%arg14 : memref<16x32xf32, #tpu.memory_space<vmem>>) target_semaphore(%172 : memref<!tpu.dma_semaphore, #tpu.memory_space<semaphore_mem>>)
      %c0_i32_59 = arith.constant 0 : i32
      %173 = tpu.memref_slice %arg17[%c0_i32_59] : memref<3x!tpu.dma_semaphore, #tpu.memory_space<semaphore_mem>> -> memref<1x!tpu.dma_semaphore, #tpu.memory_space<semaphore_mem>>
      %174 = tpu.memref_squeeze %173 : memref<1x!tpu.dma_semaphore, #tpu.memory_space<semaphore_mem>> -> memref<!tpu.dma_semaphore, #tpu.memory_space<semaphore_mem>>
      tpu.wait_dma2 semaphore(%174 : memref<!tpu.dma_semaphore, #tpu.memory_space<semaphore_mem>>) src(%arg1 : memref<16x32xf32, #tpu.memory_space<any>>) dst(%arg14 : memref<16x32xf32, #tpu.memory_space<vmem>>)
      %c0_60 = arith.constant 0 : index
      %c0_61 = arith.constant 0 : index
      %175 = vector.load %arg14[%c0_60, %c0_61] : memref<16x32xf32, #tpu.memory_space<vmem>>, vector<16x32xf32>
      %c0_62 = arith.constant 0 : index
      %c0_63 = arith.constant 0 : index
      %176 = vector.load %arg3[%c0_62, %c0_63] : memref<2x32xf32, #tpu.memory_space<vmem>>, vector<1x32xf32>
      %c1 = arith.constant 1 : index
      %c0_64 = arith.constant 0 : index
      %177 = vector.load %arg3[%c1, %c0_64] : memref<2x32xf32, #tpu.memory_space<vmem>>, vector<1x32xf32>
      %cst_65 = arith.constant dense<0.000000e+00> : vector<16xf32>
      %178 = vector.multi_reduction <add>, %175, %cst_65 [1] : vector<16x32xf32> to vector<16xf32>
      %179 = vector.shape_cast %178 : vector<16xf32> to vector<16x1xf32>
      %cst_66 = arith.constant 3.200000e+01 : f32
      %180 = vector.broadcast %cst_66 : f32 to vector<16x1xf32>
      %181 = arith.divf %179, %180 : vector<16x1xf32>
      %182 = vector.broadcast %181 : vector<16x1xf32> to vector<16x32xf32>
      %183 = arith.subf %175, %182 : vector<16x32xf32>
      %184 = arith.mulf %183, %183 : vector<16x32xf32>
      %cst_67 = arith.constant dense<0.000000e+00> : vector<16xf32>
      %185 = vector.multi_reduction <add>, %184, %cst_67 [1] : vector<16x32xf32> to vector<16xf32>
      %186 = vector.shape_cast %185 : vector<16xf32> to vector<16x1xf32>
      %cst_68 = arith.constant 3.200000e+01 : f32
      %187 = vector.broadcast %cst_68 : f32 to vector<16x1xf32>
      %188 = arith.divf %186, %187 : vector<16x1xf32>
      %cst_69 = arith.constant 9.99999996E-13 : f32
      %189 = vector.broadcast %cst_69 : f32 to vector<16x1xf32>
      %190 = arith.addf %188, %189 : vector<16x1xf32>
      %191 = math.rsqrt %190 : vector<16x1xf32>
      %192 = vector.broadcast %191 : vector<16x1xf32> to vector<16x32xf32>
      %193 = arith.mulf %183, %192 : vector<16x32xf32>
      %194 = vector.broadcast %176 : vector<1x32xf32> to vector<16x32xf32>
      %195 = arith.mulf %193, %194 : vector<16x32xf32>
      %196 = vector.broadcast %177 : vector<1x32xf32> to vector<16x32xf32>
      %197 = arith.addf %195, %196 : vector<16x32xf32>
      %c0_70 = arith.constant 0 : index
      %c0_71 = arith.constant 0 : index
      %198 = vector.load %arg14[%c0_70, %c0_71] : memref<16x32xf32, #tpu.memory_space<vmem>>, vector<16x32xf32>
      tpu.vector_store %arg14[%c0_70, %c0_71], %197 {strides = array<i32>} : memref<16x32xf32, #tpu.memory_space<vmem>>, vector<16x32xf32>,
    } else {
    }
    %c1_i32 = arith.constant 1 : i32
    %3 = arith.cmpi eq, %arg0, %c1_i32 : i32
    %4 = arith.extui %3 : i1 to i32
    %c0_i32_1 = arith.constant 0 : i32
    %5 = arith.cmpi ne, %4, %c0_i32_1 : i32
    scf.if %5 {
      %c1_i32_58 = arith.constant 1 : i32
      %171 = tpu.memref_slice %arg17[%c1_i32_58] : memref<3x!tpu.dma_semaphore, #tpu.memory_space<semaphore_mem>> -> memref<1x!tpu.dma_semaphore, #tpu.memory_space<semaphore_mem>>
      %172 = tpu.memref_squeeze %171 : memref<1x!tpu.dma_semaphore, #tpu.memory_space<semaphore_mem>> -> memref<!tpu.dma_semaphore, #tpu.memory_space<semaphore_mem>>
      tpu.enqueue_dma source(%arg11 : memref<32x32xbf16, #tpu.memory_space<any>>) target(%arg15 : memref<32x32xbf16, #tpu.memory_space<vmem>>) target_semaphore(%172 : memref<!tpu.dma_semaphore, #tpu.memory_space<semaphore_mem>>)
      %c2_i32 = arith.constant 2 : i32
      %173 = tpu.memref_slice %arg17[%c2_i32] : memref<3x!tpu.dma_semaphore, #tpu.memory_space<semaphore_mem>> -> memref<1x!tpu.dma_semaphore, #tpu.memory_space<semaphore_mem>>
      %174 = tpu.memref_squeeze %173 : memref<1x!tpu.dma_semaphore, #tpu.memory_space<semaphore_mem>> -> memref<!tpu.dma_semaphore, #tpu.memory_space<semaphore_mem>>
      tpu.enqueue_dma source(%arg12 : memref<32x128xbf16, #tpu.memory_space<any>>) target(%arg16 : memref<32x128xbf16, #tpu.memory_space<vmem>>) target_semaphore(%174 : memref<!tpu.dma_semaphore, #tpu.memory_space<semaphore_mem>>)
    } else {
    }
    %c0 = arith.constant 0 : index
    %c0_2 = arith.constant 0 : index
    %6 = vector.load %arg14[%c0, %c0_2] : memref<16x32xf32, #tpu.memory_space<vmem>>, vector<16x32xf32>
    %7 = arith.truncf %6 : vector<16x32xf32> to vector<16x32xbf16>
    %c0_3 = arith.constant 0 : index
    %c0_4 = arith.constant 0 : index
    %c0_5 = arith.constant 0 : index
    %8 = vector.load %arg8[%c0_3, %c0_4, %c0_5] : memref<1x8x128xf32, #tpu.memory_space<vmem>>, vector<1x8x128xf32>
    %9 = vector.shape_cast %8 : vector<1x8x128xf32> to vector<8x128xf32>
    %10 = vector.extract_strided_slice %9 {offsets = [0, 0], sizes = [1, 96], strides = [1, 1]} : vector<8x128xf32> to vector<1x96xf32>
    %11 = vector.extract_strided_slice %9 {offsets = [1, 0], sizes = [1, 32], strides = [1, 1]} : vector<8x128xf32> to vector<1x32xf32>
    %12 = vector.extract_strided_slice %9 {offsets = [2, 0], sizes = [1, 32], strides = [1, 1]} : vector<8x128xf32> to vector<1x32xf32>
    %13 = vector.extract_strided_slice %9 {offsets = [3, 0], sizes = [1, 32], strides = [1, 1]} : vector<8x128xf32> to vector<1x32xf32>
    %14 = vector.extract_strided_slice %9 {offsets = [4, 0], sizes = [1, 64], strides = [1, 1]} : vector<8x128xf32> to vector<1x64xf32>
    %15 = vector.extract_strided_slice %9 {offsets = [5, 0], sizes = [1, 32], strides = [1, 1]} : vector<8x128xf32> to vector<1x32xf32>
    %16 = vector.extract_strided_slice %9 {offsets = [6, 0], sizes = [1, 32], strides = [1, 1]} : vector<8x128xf32> to vector<1x32xf32>
    %17 = vector.extract_strided_slice %9 {offsets = [7, 0], sizes = [1, 32], strides = [1, 1]} : vector<8x128xf32> to vector<1x32xf32>
    %c0_6 = arith.constant 0 : index
    %c0_7 = arith.constant 0 : index
    %c0_8 = arith.constant 0 : index
    %18 = vector.load %arg4[%c0_6, %c0_7, %c0_8] : memref<1x32x96xbf16, #tpu.memory_space<vmem>>, vector<1x32x96xbf16>
    %19 = vector.shape_cast %18 : vector<1x32x96xbf16> to vector<32x96xbf16>
    %cst = arith.constant dense<0.000000e+00> : vector<16x96xf32>
    %20 = tpu.matmul %7, %19, %cst {dimension_numbers = #tpu.dot_dimension_numbers<[1], [0], [0], [1], [0, 0, 1, 1], [], []>} : vector<16x32xbf16>, vector<32x96xbf16>, vector<16x96xf32> -> vector<16x96xf32>
    %21 = vector.broadcast %10 : vector<1x96xf32> to vector<16x96xf32>
    %22 = arith.addf %20, %21 : vector<16x96xf32>
    %23 = vector.extract_strided_slice %22 {offsets = [0, 0], sizes = [16, 32], strides = [1, 1]} : vector<16x96xf32> to vector<16x32xf32>
    %24 = vector.extract_strided_slice %23 {offsets = [0, 0], sizes = [16, 16], strides = [1, 1]} : vector<16x32xf32> to vector<16x16xf32>
    %25 = vector.shape_cast %24 : vector<16x16xf32> to vector<2x8x16xf32>
    %26 = vector.extract_strided_slice %23 {offsets = [0, 16], sizes = [16, 16], strides = [1, 1]} : vector<16x32xf32> to vector<16x16xf32>
    %27 = vector.shape_cast %26 : vector<16x16xf32> to vector<2x8x16xf32>
    %28 = tpu.concatenate %25, %27 in 0 : vector<2x8x16xf32>, vector<2x8x16xf32> -> vector<4x8x16xf32>
    %29 = arith.truncf %28 : vector<4x8x16xf32> to vector<4x8x16xbf16>
    %30 = vector.extract_strided_slice %22 {offsets = [0, 32], sizes = [16, 32], strides = [1, 1]} : vector<16x96xf32> to vector<16x32xf32>
    %31 = vector.extract_strided_slice %30 {offsets = [0, 0], sizes = [16, 16], strides = [1, 1]} : vector<16x32xf32> to vector<16x16xf32>
    %32 = vector.shape_cast %31 : vector<16x16xf32> to vector<2x8x16xf32>
    %33 = vector.extract_strided_slice %30 {offsets = [0, 16], sizes = [16, 16], strides = [1, 1]} : vector<16x32xf32> to vector<16x16xf32>
    %34 = vector.shape_cast %33 : vector<16x16xf32> to vector<2x8x16xf32>
    %35 = tpu.concatenate %32, %34 in 0 : vector<2x8x16xf32>, vector<2x8x16xf32> -> vector<4x8x16xf32>
    %36 = arith.truncf %35 : vector<4x8x16xf32> to vector<4x8x16xbf16>
    %37 = vector.extract_strided_slice %22 {offsets = [0, 64], sizes = [16, 32], strides = [1, 1]} : vector<16x96xf32> to vector<16x32xf32>
    %38 = vector.extract_strided_slice %37 {offsets = [0, 0], sizes = [16, 16], strides = [1, 1]} : vector<16x32xf32> to vector<16x16xf32>
    %39 = vector.shape_cast %38 : vector<16x16xf32> to vector<2x8x16xf32>
    %40 = vector.extract_strided_slice %37 {offsets = [0, 16], sizes = [16, 16], strides = [1, 1]} : vector<16x32xf32> to vector<16x16xf32>
    %41 = vector.shape_cast %40 : vector<16x16xf32> to vector<2x8x16xf32>
    %42 = tpu.concatenate %39, %41 in 0 : vector<2x8x16xf32>, vector<2x8x16xf32> -> vector<4x8x16xf32>
    %43 = arith.truncf %42 : vector<4x8x16xf32> to vector<4x8x16xbf16>
    "tpu.trace_start"() <{level = 10 : i32, message = "bqd,bkd->bqk"}> : () -> ()
    %cst_9 = arith.constant dense<0.000000e+00> : vector<4x8x8xf32>
    %44 = tpu.matmul %29, %36, %cst_9 {dimension_numbers = #tpu.dot_dimension_numbers<[2], [2], [1], [1], [0, 0, 0, 1, 1, 1], [0], [0]>} : vector<4x8x16xbf16>, vector<4x8x16xbf16>, vector<4x8x8xf32> -> vector<4x8x8xf32>
    "tpu.trace_stop"() : () -> ()
    %c0_10 = arith.constant 0 : index
    %c0_11 = arith.constant 0 : index
    %c0_12 = arith.constant 0 : index
    %45 = vector.load %arg2[%c0_10, %c0_11, %c0_12] : memref<2x1x8xf32, #tpu.memory_space<vmem>>, vector<2x1x8xf32>
    %46 = tpu.concatenate %45, %45 in 0 : vector<2x1x8xf32>, vector<2x1x8xf32> -> vector<4x1x8xf32>
    %47 = vector.broadcast %46 : vector<4x1x8xf32> to vector<4x8x8xf32>
    %48 = arith.addf %44, %47 : vector<4x8x8xf32>
    %cst_13 = arith.constant dense<0xFF800000> : vector<4x8xf32>
    %49 = vector.multi_reduction <maximumf>, %48, %cst_13 [2] : vector<4x8x8xf32> to vector<4x8xf32>
    %50 = vector.shape_cast %49 : vector<4x8xf32> to vector<4x8x1xf32>
    %51 = vector.broadcast %50 : vector<4x8x1xf32> to vector<4x8x8xf32>
    %52 = arith.subf %48, %51 : vector<4x8x8xf32>
    %53 = math.exp %52 : vector<4x8x8xf32>
    %cst_14 = arith.constant dense<0.000000e+00> : vector<4x8xf32>
    %54 = vector.multi_reduction <add>, %53, %cst_14 [2] : vector<4x8x8xf32> to vector<4x8xf32>
    %55 = vector.shape_cast %54 : vector<4x8xf32> to vector<4x8x1xf32>
    %56 = tpu.reciprocal %55 {approx = true} : vector<4x8x1xf32> -> vector<4x8x1xf32>
    %57 = vector.broadcast %56 : vector<4x8x1xf32> to vector<4x8x8xf32>
    %58 = arith.mulf %53, %57 : vector<4x8x8xf32>
    %59 = arith.truncf %58 : vector<4x8x8xf32> to vector<4x8x8xbf16>
    "tpu.trace_start"() <{level = 10 : i32, message = "bqk,bkd->bqd"}> : () -> ()
    %cst_15 = arith.constant dense<0.000000e+00> : vector<4x8x16xf32>
    %60 = tpu.matmul %59, %43, %cst_15 {dimension_numbers = #tpu.dot_dimension_numbers<[2], [1], [1], [2], [0, 0, 0, 1, 1, 2], [0], [0]>} : vector<4x8x8xbf16>, vector<4x8x16xbf16>, vector<4x8x16xf32> -> vector<4x8x16xf32>
    "tpu.trace_stop"() : () -> ()
    %61 = vector.extract_strided_slice %60 {offsets = [0, 0, 0], sizes = [2, 8, 16], strides = [1, 1, 1]} : vector<4x8x16xf32> to vector<2x8x16xf32>
    %62 = vector.shape_cast %61 : vector<2x8x16xf32> to vector<16x16xf32>
    %63 = vector.extract_strided_slice %60 {offsets = [2, 0, 0], sizes = [2, 8, 16], strides = [1, 1, 1]} : vector<4x8x16xf32> to vector<2x8x16xf32>
    %64 = vector.shape_cast %63 : vector<2x8x16xf32> to vector<16x16xf32>
    %65 = tpu.concatenate %62, %64 in 1 : vector<16x16xf32>, vector<16x16xf32> -> vector<16x32xf32>
    %66 = arith.truncf %65 : vector<16x32xf32> to vector<16x32xbf16>
    %c0_16 = arith.constant 0 : index
    %c0_17 = arith.constant 0 : index
    %c0_18 = arith.constant 0 : index
    %67 = vector.load %arg5[%c0_16, %c0_17, %c0_18] : memref<1x32x32xbf16, #tpu.memory_space<vmem>>, vector<1x32x32xbf16>
    %68 = vector.shape_cast %67 : vector<1x32x32xbf16> to vector<32x32xbf16>
    %cst_19 = arith.constant dense<0.000000e+00> : vector<16x32xf32>
    %69 = tpu.matmul %66, %68, %cst_19 {dimension_numbers = #tpu.dot_dimension_numbers<[1], [0], [0], [1], [0, 0, 1, 1], [], []>} : vector<16x32xbf16>, vector<32x32xbf16>, vector<16x32xf32> -> vector<16x32xf32>
    %70 = vector.broadcast %11 : vector<1x32xf32> to vector<16x32xf32>
    %71 = arith.addf %69, %70 : vector<16x32xf32>
    %72 = arith.addf %71, %6 : vector<16x32xf32>
    %cst_20 = arith.constant dense<0.000000e+00> : vector<16xf32>
    %73 = vector.multi_reduction <add>, %72, %cst_20 [1] : vector<16x32xf32> to vector<16xf32>
    %74 = vector.shape_cast %73 : vector<16xf32> to vector<16x1xf32>
    %cst_21 = arith.constant 3.200000e+01 : f32
    %75 = vector.broadcast %cst_21 : f32 to vector<16x1xf32>
    %76 = arith.divf %74, %75 : vector<16x1xf32>
    %77 = vector.broadcast %76 : vector<16x1xf32> to vector<16x32xf32>
    %78 = arith.subf %72, %77 : vector<16x32xf32>
    %79 = arith.mulf %78, %78 : vector<16x32xf32>
    %cst_22 = arith.constant dense<0.000000e+00> : vector<16xf32>
    %80 = vector.multi_reduction <add>, %79, %cst_22 [1] : vector<16x32xf32> to vector<16xf32>
    %81 = vector.shape_cast %80 : vector<16xf32> to vector<16x1xf32>
    %cst_23 = arith.constant 3.200000e+01 : f32
    %82 = vector.broadcast %cst_23 : f32 to vector<16x1xf32>
    %83 = arith.divf %81, %82 : vector<16x1xf32>
    %cst_24 = arith.constant 9.99999996E-13 : f32
    %84 = vector.broadcast %cst_24 : f32 to vector<16x1xf32>
    %85 = arith.addf %83, %84 : vector<16x1xf32>
    %86 = math.rsqrt %85 : vector<16x1xf32>
    %87 = vector.broadcast %86 : vector<16x1xf32> to vector<16x32xf32>
    %88 = arith.mulf %78, %87 : vector<16x32xf32>
    %89 = vector.broadcast %12 : vector<1x32xf32> to vector<16x32xf32>
    %90 = arith.mulf %88, %89 : vector<16x32xf32>
    %91 = vector.broadcast %13 : vector<1x32xf32> to vector<16x32xf32>
    %92 = arith.addf %90, %91 : vector<16x32xf32>
    %93 = arith.truncf %92 : vector<16x32xf32> to vector<16x32xbf16>
    %c0_25 = arith.constant 0 : index
    %c0_26 = arith.constant 0 : index
    %c0_27 = arith.constant 0 : index
    %94 = vector.load %arg6[%c0_25, %c0_26, %c0_27] : memref<1x32x64xbf16, #tpu.memory_space<vmem>>, vector<1x32x64xbf16>
    %95 = vector.shape_cast %94 : vector<1x32x64xbf16> to vector<32x64xbf16>
    %cst_28 = arith.constant dense<0.000000e+00> : vector<16x64xf32>
    %96 = tpu.matmul %93, %95, %cst_28 {dimension_numbers = #tpu.dot_dimension_numbers<[1], [0], [0], [1], [0, 0, 1, 1], [], []>} : vector<16x32xbf16>, vector<32x64xbf16>, vector<16x64xf32> -> vector<16x64xf32>
    %97 = vector.broadcast %14 : vector<1x64xf32> to vector<16x64xf32>
    %98 = arith.addf %96, %97 : vector<16x64xf32>
    %cst_29 = arith.constant 5.000000e-01 : f32
    %99 = vector.broadcast %cst_29 : f32 to vector<16x64xf32>
    %100 = arith.mulf %99, %98 : vector<16x64xf32>
    %cst_30 = arith.constant 0.707106769 : f32
    %101 = vector.broadcast %cst_30 : f32 to vector<16x64xf32>
    %102 = arith.mulf %98, %101 : vector<16x64xf32>
    %cst_31 = arith.constant 0.000000e+00 : f32
    %103 = vector.broadcast %cst_31 : f32 to vector<16x64xf32>
    %104 = arith.cmpf oge, %102, %103 : vector<16x64xf32>
    %cst_32 = arith.constant 1.000000e+00 : f32
    %cst_33 = arith.constant -1.000000e+00 : f32
    %105 = vector.broadcast %cst_32 : f32 to vector<16x64xf32>
    %106 = vector.broadcast %cst_33 : f32 to vector<16x64xf32>
    %107 = arith.select %104, %105, %106 : vector<16x64xi1>, vector<16x64xf32>
    %108 = math.absf %102 : vector<16x64xf32>
    %cst_34 = arith.constant 0.327591091 : f32
    %109 = vector.broadcast %cst_34 : f32 to vector<16x64xf32>
    %110 = arith.mulf %109, %108 : vector<16x64xf32>
    %cst_35 = arith.constant 1.000000e+00 : f32
    %111 = vector.broadcast %cst_35 : f32 to vector<16x64xf32>
    %112 = arith.addf %111, %110 : vector<16x64xf32>
    %cst_36 = arith.constant 1.000000e+00 : f32
    %113 = vector.broadcast %cst_36 : f32 to vector<16x64xf32>
    %114 = arith.divf %113, %112 : vector<16x64xf32>
    %cst_37 = arith.constant 1.06140542 : f32
    %115 = vector.broadcast %cst_37 : f32 to vector<16x64xf32>
    %116 = arith.mulf %115, %114 : vector<16x64xf32>
    %cst_38 = arith.constant -1.45315206 : f32
    %117 = vector.broadcast %cst_38 : f32 to vector<16x64xf32>
    %118 = arith.addf %116, %117 : vector<16x64xf32>
    %119 = arith.mulf %118, %114 : vector<16x64xf32>
    %cst_39 = arith.constant 1.42141378 : f32
    %120 = vector.broadcast %cst_39 : f32 to vector<16x64xf32>
    %121 = arith.addf %119, %120 : vector<16x64xf32>
    %122 = arith.mulf %121, %114 : vector<16x64xf32>
    %cst_40 = arith.constant -0.284496725 : f32
    %123 = vector.broadcast %cst_40 : f32 to vector<16x64xf32>
    %124 = arith.addf %122, %123 : vector<16x64xf32>
    %125 = arith.mulf %124, %114 : vector<16x64xf32>
    %cst_41 = arith.constant 0.254829586 : f32
    %126 = vector.broadcast %cst_41 : f32 to vector<16x64xf32>
    %127 = arith.addf %125, %126 : vector<16x64xf32>
    %128 = arith.mulf %127, %114 : vector<16x64xf32>
    %cst_42 = arith.constant 0.000000e+00 : f32
    %129 = vector.broadcast %cst_42 : f32 to vector<16x64xf32>
    %130 = arith.subf %129, %108 : vector<16x64xf32>
    %131 = arith.mulf %130, %108 : vector<16x64xf32>
    %132 = math.exp %131 : vector<16x64xf32>
    %133 = arith.mulf %128, %132 : vector<16x64xf32>
    %cst_43 = arith.constant 1.000000e+00 : f32
    %134 = vector.broadcast %cst_43 : f32 to vector<16x64xf32>
    %135 = arith.subf %134, %133 : vector<16x64xf32>
    %136 = arith.mulf %107, %135 : vector<16x64xf32>
    %cst_44 = arith.constant 1.000000e+00 : f32
    %137 = vector.broadcast %cst_44 : f32 to vector<16x64xf32>
    %138 = arith.addf %137, %136 : vector<16x64xf32>
    %139 = arith.mulf %100, %138 : vector<16x64xf32>
    %140 = arith.truncf %139 : vector<16x64xf32> to vector<16x64xbf16>
    %c0_45 = arith.constant 0 : index
    %c0_46 = arith.constant 0 : index
    %c0_47 = arith.constant 0 : index
    %141 = vector.load %arg7[%c0_45, %c0_46, %c0_47] : memref<1x64x32xbf16, #tpu.memory_space<vmem>>, vector<1x64x32xbf16>
    %142 = vector.shape_cast %141 : vector<1x64x32xbf16> to vector<64x32xbf16>
    %cst_48 = arith.constant dense<0.000000e+00> : vector<16x32xf32>
    %143 = tpu.matmul %140, %142, %cst_48 {dimension_numbers = #tpu.dot_dimension_numbers<[1], [0], [0], [1], [0, 0, 1, 1], [], []>} : vector<16x64xbf16>, vector<64x32xbf16>, vector<16x32xf32> -> vector<16x32xf32>
    %144 = vector.broadcast %15 : vector<1x32xf32> to vector<16x32xf32>
    %145 = arith.addf %143, %144 : vector<16x32xf32>
    %146 = arith.addf %145, %92 : vector<16x32xf32>
    %cst_49 = arith.constant dense<0.000000e+00> : vector<16xf32>
    %147 = vector.multi_reduction <add>, %146, %cst_49 [1] : vector<16x32xf32> to vector<16xf32>
    %148 = vector.shape_cast %147 : vector<16xf32> to vector<16x1xf32>
    %cst_50 = arith.constant 3.200000e+01 : f32
    %149 = vector.broadcast %cst_50 : f32 to vector<16x1xf32>
    %150 = arith.divf %148, %149 : vector<16x1xf32>
    %151 = vector.broadcast %150 : vector<16x1xf32> to vector<16x32xf32>
    %152 = arith.subf %146, %151 : vector<16x32xf32>
    %153 = arith.mulf %152, %152 : vector<16x32xf32>
    %cst_51 = arith.constant dense<0.000000e+00> : vector<16xf32>
    %154 = vector.multi_reduction <add>, %153, %cst_51 [1] : vector<16x32xf32> to vector<16xf32>
    %155 = vector.shape_cast %154 : vector<16xf32> to vector<16x1xf32>
    %cst_52 = arith.constant 3.200000e+01 : f32
    %156 = vector.broadcast %cst_52 : f32 to vector<16x1xf32>
    %157 = arith.divf %155, %156 : vector<16x1xf32>
    %cst_53 = arith.constant 9.99999996E-13 : f32
    %158 = vector.broadcast %cst_53 : f32 to vector<16x1xf32>
    %159 = arith.addf %157, %158 : vector<16x1xf32>
    %160 = math.rsqrt %159 : vector<16x1xf32>
    %161 = vector.broadcast %160 : vector<16x1xf32> to vector<16x32xf32>
    %162 = arith.mulf %152, %161 : vector<16x32xf32>
    %163 = vector.broadcast %16 : vector<1x32xf32> to vector<16x32xf32>
    %164 = arith.mulf %162, %163 : vector<16x32xf32>
    %165 = vector.broadcast %17 : vector<1x32xf32> to vector<16x32xf32>
    %166 = arith.addf %164, %165 : vector<16x32xf32>
    %c0_54 = arith.constant 0 : index
    %c0_55 = arith.constant 0 : index
    %167 = vector.load %arg14[%c0_54, %c0_55] : memref<16x32xf32, #tpu.memory_space<vmem>>, vector<16x32xf32>
    tpu.vector_store %arg14[%c0_54, %c0_55], %166 {strides = array<i32>} : memref<16x32xf32, #tpu.memory_space<vmem>>, vector<16x32xf32>,
    %c1_i32_56 = arith.constant 1 : i32
    %168 = arith.cmpi eq, %arg0, %c1_i32_56 : i32
    %169 = arith.extui %168 : i1 to i32
    %c0_i32_57 = arith.constant 0 : i32
    %170 = arith.cmpi ne, %169, %c0_i32_57 : i32
    scf.if %170 {
      %c1_i32_58 = arith.constant 1 : i32
      %171 = tpu.memref_slice %arg17[%c1_i32_58] : memref<3x!tpu.dma_semaphore, #tpu.memory_space<semaphore_mem>> -> memref<1x!tpu.dma_semaphore, #tpu.memory_space<semaphore_mem>>
      %172 = tpu.memref_squeeze %171 : memref<1x!tpu.dma_semaphore, #tpu.memory_space<semaphore_mem>> -> memref<!tpu.dma_semaphore, #tpu.memory_space<semaphore_mem>>
      tpu.wait_dma2 semaphore(%172 : memref<!tpu.dma_semaphore, #tpu.memory_space<semaphore_mem>>) src(%arg11 : memref<32x32xbf16, #tpu.memory_space<any>>) dst(%arg15 : memref<32x32xbf16, #tpu.memory_space<vmem>>)
      %c2_i32 = arith.constant 2 : i32
      %173 = tpu.memref_slice %arg17[%c2_i32] : memref<3x!tpu.dma_semaphore, #tpu.memory_space<semaphore_mem>> -> memref<1x!tpu.dma_semaphore, #tpu.memory_space<semaphore_mem>>
      %174 = tpu.memref_squeeze %173 : memref<1x!tpu.dma_semaphore, #tpu.memory_space<semaphore_mem>> -> memref<!tpu.dma_semaphore, #tpu.memory_space<semaphore_mem>>
      tpu.wait_dma2 semaphore(%174 : memref<!tpu.dma_semaphore, #tpu.memory_space<semaphore_mem>>) src(%arg12 : memref<32x128xbf16, #tpu.memory_space<any>>) dst(%arg16 : memref<32x128xbf16, #tpu.memory_space<vmem>>)
      %175 = vector.shape_cast %166 : vector<16x32xf32> to vector<2x8x32xf32>
      %176 = vector.extract_strided_slice %175 {offsets = [0, 0, 0], sizes = [2, 1, 32], strides = [1, 1, 1]} : vector<2x8x32xf32> to vector<2x1x32xf32>
      %177 = vector.shape_cast %176 : vector<2x1x32xf32> to vector<2x32xf32>
      %178 = arith.truncf %177 : vector<2x32xf32> to vector<2x32xbf16>
      %c0_59 = arith.constant 0 : index
      %c0_60 = arith.constant 0 : index
      %179 = vector.load %arg15[%c0_59, %c0_60] : memref<32x32xbf16, #tpu.memory_space<vmem>>, vector<32x32xbf16>
      %cst_61 = arith.constant dense<0.000000e+00> : vector<2x32xf32>
      %180 = tpu.matmul %178, %179, %cst_61 {dimension_numbers = #tpu.dot_dimension_numbers<[1], [0], [0], [1], [0, 0, 1, 1], [], []>} : vector<2x32xbf16>, vector<32x32xbf16>, vector<2x32xf32> -> vector<2x32xf32>
      %c0_62 = arith.constant 0 : index
      %c0_63 = arith.constant 0 : index
      %181 = vector.load %arg9[%c0_62, %c0_63] : memref<1x32xf32, #tpu.memory_space<vmem>>, vector<1x32xf32>
      %182 = vector.broadcast %181 : vector<1x32xf32> to vector<2x32xf32>
      %183 = arith.addf %180, %182 : vector<2x32xf32>
      %184 = math.tanh %183 : vector<2x32xf32>
      %185 = arith.truncf %184 : vector<2x32xf32> to vector<2x32xbf16>
      %c0_64 = arith.constant 0 : index
      %c0_65 = arith.constant 0 : index
      %186 = vector.load %arg16[%c0_64, %c0_65] : memref<32x128xbf16, #tpu.memory_space<vmem>>, vector<32x128xbf16>
      %cst_66 = arith.constant dense<0.000000e+00> : vector<2x128xf32>
      %187 = tpu.matmul %185, %186, %cst_66 {dimension_numbers = #tpu.dot_dimension_numbers<[1], [0], [0], [1], [0, 0, 1, 1], [], []>} : vector<2x32xbf16>, vector<32x128xbf16>, vector<2x128xf32> -> vector<2x128xf32>
      %c0_67 = arith.constant 0 : index
      %c0_68 = arith.constant 0 : index
      %188 = vector.load %arg10[%c0_67, %c0_68] : memref<1x128xf32, #tpu.memory_space<vmem>>, vector<1x128xf32>
      %189 = vector.broadcast %188 : vector<1x128xf32> to vector<2x128xf32>
      %190 = arith.addf %187, %189 : vector<2x128xf32>
      %c0_69 = arith.constant 0 : index
      %c0_70 = arith.constant 0 : index
      %191 = vector.load %arg13[%c0_69, %c0_70] : memref<2x128xf32, #tpu.memory_space<vmem>>, vector<2x128xf32>
      tpu.vector_store %arg13[%c0_69, %c0_70], %190 {strides = array<i32>} : memref<2x128xf32, #tpu.memory_space<vmem>>, vector<2x128xf32>,
    } else {
    }
    return
  }
  func.func @transform_1(%arg0: i32) -> (i32, i32, i32) {
    %c0_i32 = arith.constant 0 : i32
    %c0_i32_0 = arith.constant 0 : i32
    %c0_i32_1 = arith.constant 0 : i32
    %c0_i32_2 = arith.constant 0 : i32
    return %c0_i32, %c0_i32_0, %c0_i32_1 : i32, i32, i32
  }
  func.func @transform_2(%arg0: i32) -> (i32, i32) {
    %c0_i32 = arith.constant 0 : i32
    %c0_i32_0 = arith.constant 0 : i32
    %c0_i32_1 = arith.constant 0 : i32
    return %c0_i32, %c0_i32_0 : i32, i32
  }
  func.func @transform_3(%arg0: i32) -> (i32, i32, i32) {
    %c0_i32 = arith.constant 0 : i32
    %c0_i32_0 = arith.constant 0 : i32
    %c0_i32_1 = arith.constant 0 : i32
    return %arg0, %c0_i32, %c0_i32_0 : i32, i32, i32
  }
  func.func @transform_4(%arg0: i32) -> (i32, i32, i32) {
    %c0_i32 = arith.constant 0 : i32
    %c0_i32_0 = arith.constant 0 : i32
    %c0_i32_1 = arith.constant 0 : i32
    return %arg0, %c0_i32, %c0_i32_0 : i32, i32, i32
  }
  func.func @transform_5(%arg0: i32) -> (i32, i32, i32) {
    %c0_i32 = arith.constant 0 : i32
    %c0_i32_0 = arith.constant 0 : i32
    %c0_i32_1 = arith.constant 0 : i32
    return %arg0, %c0_i32, %c0_i32_0 : i32, i32, i32
  }
  func.func @transform_6(%arg0: i32) -> (i32, i32, i32) {
    %c0_i32 = arith.constant 0 : i32
    %c0_i32_0 = arith.constant 0 : i32
    %c0_i32_1 = arith.constant 0 : i32
    return %arg0, %c0_i32, %c0_i32_0 : i32, i32, i32
  }
  func.func @transform_7(%arg0: i32) -> (i32, i32, i32) {
    %c0_i32 = arith.constant 0 : i32
    %c0_i32_0 = arith.constant 0 : i32
    %c0_i32_1 = arith.constant 0 : i32
    return %arg0, %c0_i32, %c0_i32_0 : i32, i32, i32
  }
  func.func @transform_8(%arg0: i32) -> (i32, i32) {
    %c0_i32 = arith.constant 0 : i32
    %c0_i32_0 = arith.constant 0 : i32
    %c0_i32_1 = arith.constant 0 : i32
    return %c0_i32, %c0_i32_0 : i32, i32
  }
  func.func @transform_9(%arg0: i32) -> (i32, i32) {
    %c0_i32 = arith.constant 0 : i32
    %c0_i32_0 = arith.constant 0 : i32
    %c0_i32_1 = arith.constant 0 : i32
    return %c0_i32, %c0_i32_0 : i32, i32
  }
  func.func @transform_12(%arg0: i32) -> (i32, i32) {
    %c0_i32 = arith.constant 0 : i32
    %c0_i32_0 = arith.constant 0 : i32
    %c0_i32_1 = arith.constant 0 : i32
    return %c0_i32, %c0_i32_0 : i32, i32
  }
}

</mosaic_0001>

<bundles_post_ra>
// kernel: tpu_custom_call.1
= control target key start
LH: loop header
LB: loop body
LE: loop exit
PB: predicated region body
PF: predicated region fallthrough
CT: control target
= control target key end

     0   :  { %s2909_s0 = inlined_call_operand.hbm [shape: f32[16,32], index: 0, kind: input, shape index: {}]   ;;  %s2910_s1 = inlined_call_operand.hbm [shape: f32[2,1,8], index: 1, kind: input, shape index: {}]   ;;  %s2911_s2 = inlined_call_operand.hbm [shape: f32[2,32], index: 2, kind: input, shape index: {}]   ;;  %s2912_s3 = inlined_call_operand.vmem [shape: bf16[2,32,96], index: 3, kind: input, shape index: {}]   ;;  %s2913_s4 = inlined_call_operand.vmem [shape: bf16[2,32,32], index: 4, kind: input, shape index: {}]   ;;  %s2914_s5 = inlined_call_operand.vmem [shape: bf16[2,32,64], index: 5, kind: input, shape index: {}]   ;;  %s2915_s6 = inlined_call_operand.vmem [shape: bf16[2,64,32], index: 6, kind: input, shape index: {}]   ;;  %s2916_s7 = inlined_call_operand.hbm [shape: f32[2,8,128], index: 7, kind: input, shape index: {}]   ;;  %s2917_s8 = inlined_call_operand.hbm [shape: f32[1,32], index: 8, kind: input, shape index: {}]   ;;  %s2918_s9 = inlined_call_operand.hbm [shape: f32[1,128], index: 9, kind: input, shape index: {}]   ;;  %s2919_s10 = inlined_call_operand.vmem [shape: bf16[32,32], index: 10, kind: input, shape index: {}]   ;;  %s2920_s11 = inlined_call_operand.hbm [shape: bf16[32,128], index: 11, kind: input, shape index: {}]   ;;  %s2921_s12 = inlined_call_operand.hbm [shape: f32[2,128], index: 12, kind: output, shape index: {}]  }
   0x1   :  { %2925 = sst [smem:[#allocation32_spill]] %s2910_s1 }
   0x2   :  { %2926 = sst [smem:[#allocation33_spill]] %s2911_s2 }
   0x3   :  { %2927 = sst [smem:[#allocation34_spill]] %s2917_s8 }
   0x4   :  { %17 = vsyncpa [#allocation7], 0 }
   0x5   :  { %18 = vsyncpa [#allocation10], 0 }
   0x6   :  { %19 = vsyncpa [#allocation14], 0 }
   0x7   :  { %20 = vsyncpa [#allocation8], 0  ;;  %s2527_s21 = smov 0   ;;  %s2529_s22 = smov 0  }
   0x8   :  { %s2531_s23 = smov 0   ;;  %s2533_s24 = smov 0  }
   0x9 LB: > { %s2443_s25 = smov [#allocation6]   ;;  %s2548_s27 = sadd.s32 4294967295, %s2441_s24   ;;  %s2441_s24 = sphi %s2533_s24, %s2950_s24   ;;  %s2437_s23 = sphi %s2531_s23, %s2949_s23   ;;  %s2433_s22 = sphi %s2529_s22, %s2948_s22   ;;  %s2429_s21 = sphi %s2527_s21, %s2947_s21  }
   0xa   : > { %s278_s26 = sshll.u32 %s2443_s25, 4  ;;  %p1817_p0 = scmp.ge.s32.totalorder %s2441_s24, 1  ;;  %s279_s26 = int_to_ptr.vmem [resolvable:$true] %s278_s26 }
   0xb   : > { %p2922_p1 = scmp.eq.s32.totalorder %s2548_s27, 0  ;;  %p266_p2 = scmp.lt.s32.totalorder %s2441_s24, 3 }
   0xc   : > { %s2444_s29 = smov [#allocation9]   ;;  %s2445_s14 = smov [#allocation12]  }
   0xd   : > { %p2554_p4 = pnand %p1817_p0, %p266_p2  ;;  %s292_s30 = sshll.u32 %s2444_s29, 4  ;;  %s293_s30 = int_to_ptr.vmem [resolvable:$true] %s292_s30 }
   0xe   : > { %s303_s15 = sshll.u32 %s2445_s14, 4  ;;  %s2196_s16 = scalar_lea.vmem %s279_s26, 32  ;;  %s2566_s15 = int_to_ptr.vmem [resolvable:$true] %s303_s15 }
   0xf   : > { %s2928_s28 = scalar_select %p2554_p4, 1, 0 }
  0x10   : > { %p2045_p5 = pneg %p2554_p4  ;;  %p2197_p8 = scmp.ne.s32.totalorder %s279_s26, %s2196_s16 }
  0x11   : > { %p2204_p11 = scmp.lt.s32.totalorder %s279_s26, %s279_s26  ;;  %p2205_p12 = scmp.lt.s32.totalorder %s2196_s16, %s2196_s16 }
  0x12   : > { %p2562_p6 = pnand %p2045_p5, %p2922_p1 }
  0x13   : > { %p2206_p13 = por %p2205_p12, %p2204_p11 }
  0x14   : > { %p2187_p7 = pneg %p2562_p6 }
  0x16   : > { %p2199_p9 = pnand %p2197_p8, %p2187_p7 }
  0x18   : > { %p2200_p10 = pneg %p2199_p9 }
  0x1a   : > { %p2207_p0 = pnand %p2206_p13, %p2200_p10 }
  0x1c   : > { %2210 = shalt.err (!%p2207_p0)
}
  0x1d   : > { %s2446_s17 = smov 16   ;;  %s2447_s18 = smov 1  }
  0x1e   : > { %s2930_s1 = sld [smem:[#allocation32_spill]]  ;;  %s2222_s25 = scalar_lea.vmem %s293_s30, 32 }
  0x1f   : > { %p2223_p2 = scmp.ne.s32.totalorder %s293_s30, %s2222_s25  ;;  %p2230_p9 = scmp.lt.s32.totalorder %s293_s30, %s293_s30 }
  0x20   : > { %p2231_p3 = scmp.lt.s32.totalorder %s2222_s25, %s2222_s25 }
  0x21   : > { %p2225_p5 = pnand %p2223_p2, %p2187_p7 }
  0x22   : > { %p2232_p11 = por %p2231_p3, %p2230_p9 }
  0x23   : > { %p2226_p8 = pneg %p2225_p5 }
  0x24   : > { %2048 = dma.hbm_to_vmem [thread:$0]  (!%p2562_p6), %s2930_s1, 32, %s279_s26, [#allocation7], %s2446_s17, %s2446_s17, %s2447_s18  }
  0x25   : > { %p2233_p10 = pnand %p2232_p11, %p2226_p8 }
  0x27   : > { %2236 = shalt.err (!%p2233_p10)
}
  0x28   : > { %s2931_s2 = sld [smem:[#allocation33_spill]]  ;;  %s2248_s26 = scalar_lea.vmem %s2566_s15, 16 }
  0x29   : > { %p2249_p12 = scmp.ne.s32.totalorder %s2566_s15, %s2248_s26  ;;  %s2255_s16 = scalar_lea.vmem %s2566_s15, 32 }
  0x2a   : > { %p2256_p3 = scmp.lt.s32.totalorder %s2566_s15, %s2566_s15  ;;  %p2257_p2 = scmp.lt.s32.totalorder %s2255_s16, %s2248_s26 }
  0x2b   : > { %p2251_p13 = pnand %p2249_p12, %p2187_p7 }
  0x2c   : > { %p2258_p5 = por %p2257_p2, %p2256_p3 }
  0x2d   : > { %p2252_p0 = pneg %p2251_p13 }
  0x2e   : > { %2051 = dma.hbm_to_vmem [thread:$0]  (!%p2562_p6), %s2931_s2, 32, %s293_s30, [#allocation10]  }
  0x2f   : > { %p2259_p8 = pnand %p2258_p5, %p2252_p0 }
  0x31   : > { %2262 = shalt.err (!%p2259_p8)
}
  0x32   : > { %s2932_s8 = sld [smem:[#allocation34_spill]]  ;;  %s2448_s30 = smov [#allocation13]  }
  0x33   : > { %s314_s19 = sshll.u32 %s2448_s30, 4  ;;  %s315_s19 = int_to_ptr.vmem [resolvable:$true] %s314_s19 }
  0x34   : > { %s2274_s20 = scalar_lea.vmem %s315_s19, 16  ;;  %s2281_s25 = scalar_lea.vmem %s315_s19, 32 }
  0x35   : > { %p2275_p9 = scmp.ne.s32.totalorder %s315_s19, %s2274_s20  ;;  %p2282_p12 = scmp.lt.s32.totalorder %s315_s19, %s315_s19 }
  0x36   : > { %p2283_p13 = scmp.lt.s32.totalorder %s2281_s25, %s2274_s20 }
  0x37   : > { %p2277_p11 = pnand %p2275_p9, %p2187_p7 }
  0x38   : > { %2054 = dma.hbm_to_vmem [thread:$0]  (!%p2562_p6), %s2932_s8, 16, %s2566_s15, [#allocation10]  }
  0x39   : > { %p2278_p10 = pneg %p2277_p11  ;;  %p2284_p0 = por %p2283_p13, %p2282_p12 }
  0x3b   : > { %p2285_p3 = pnand %p2284_p0, %p2278_p10 }
  0x3d   : > { %2288 = shalt.err (!%p2285_p3)
}
  0x3e   : > { %2057 = dma.hbm_to_vmem [thread:$0]  (!%p2562_p6), %s2918_s9, 16, %s315_s19, [#allocation14]  }
  0x3f   : > { %s2609_s15 = sadd.s32 1, %s2441_s24   ;;  %s179_s13 = sadd.s32 1, %s2437_s23 }
  0x40   : > { %s176_s26 = ssub.s32 %s2441_s24, %s2609_s15  ;;  %p186_p7 = scmp.ne.s32.totalorder %s2437_s23, %s2433_s22 }
  0x41   : > { %p177_p2 = scmp.eq.s32.totalorder %s176_s26, 0  ;;  %p187_p5 = scmp.eq.s32.totalorder %s2441_s24, 0 }
  0x42   : > { %p192_p8 = scmp.ne.s32.totalorder %s2433_s22, %s2429_s21  ;;  %p2066_p9 = scmp.lt.s32.totalorder %s2441_s24, 2 }
  0x43   : > { %s2621_s16 = scalar_select %p177_p2, %s2437_s23, %s179_s13  }
  0x44   : > { %p188_p11 = por %p187_p5, %p186_p7  ;;  %p2625_p10 = por %p2922_p1, %p192_p8 }
  0x45   : > { %s357_s18 = sand.u32 1, %s2441_s24   ;;  %s359_s30 = sand.u32 1, %s2437_s23  }
  0x46   : > { %s2933_s17 = scalar_select %p2625_p10, 1, 0 }
  0x47   : > { %s1823_s19 = sshll.u32 %s359_s30, 3  ;;  %s1824_s20 = sshll.u32 %s2441_s24, 7 }
  0x48   : > { %s2635_s14 = scalar_lea.hbm %s2916_s7, %s1824_s20  ;;  %s361_s21 = scalar_lea.vmem [#allocation11], %s1823_s19 }
  0x49   : > { %s368_s13 = sshll.u32 %s361_s21, 4  ;;  %p2637_p6 = pnand %p2066_p9, %p188_p11  ;;  %s369_s13 = int_to_ptr.vmem [resolvable:$true] %s368_s13 }
  0x4a   : > { %s358_s1 = scalar_lea.sflag [#allocation7], %s357_s18  ;;  %s2289_s2 = scalar_lea.hbm %s2635_s14, 128 }
  0x4b   : > { %p2290_p12 = scmp.ne.s32.totalorder %s2635_s14, %s2289_s2  ;;  %p2291_p13 = pneg %p2637_p6 }
  0x4c   : > { %s2294_s20 = scalar_lea.hbm %s2916_s7, 256  ;;  %p2295_p7 = scmp.lt.s32.totalorder %s2635_s14, %s2916_s7 }
  0x4d   : > { %p2292_p0 = pnand %p2291_p13, %p2290_p12  ;;  %p2296_p2 = scmp.lt.s32.totalorder %s2294_s20, %s2289_s2 }
  0x4f   : > { %p2293_p3 = pneg %p2292_p0  ;;  %p2297_p5 = por %p2296_p2, %p2295_p7 }
  0x51   : > { %p2298_p8 = pnand %p2297_p5, %p2293_p3 }
  0x53   : > { %2301 = shalt.err (!%p2298_p8)
}
  0x54   : > { %s2302_s29 = scalar_lea.vmem %s369_s13, 128  ;;  %s2449_s18 = smov [#allocation11]  }
  0x55   : > { %p2303_p9 = scmp.ne.s32.totalorder %s369_s13, %s2302_s29  ;;  %s2307_s21 = sshll.u32 %s2449_s18, 4  ;;  %s2308_s21 = int_to_ptr.vmem [resolvable:$false] %s2307_s21 }
  0x56   : > { %s2309_s8 = scalar_lea.vmem %s2308_s21, 256  ;;  %p2310_p12 = scmp.lt.s32.totalorder %s369_s13, %s2308_s21 }
  0x57   : > { %p2305_p11 = pnand %p2303_p9, %p2291_p13  ;;  %p2311_p0 = scmp.lt.s32.totalorder %s2309_s8, %s2302_s29 }
  0x59   : > { %p2306_p1 = pneg %p2305_p11  ;;  %p2312_p10 = por %p2311_p0, %p2310_p12 }
  0x5b   : > { %p2313_p4 = pnand %p2312_p10, %p2306_p1 }
  0x5d   : > { %2316 = shalt.err (!%p2313_p4)
}
  0x5e   : > { %2061 = dma.hbm_to_vmem [thread:$0]  (!%p2637_p6), %s2635_s14, 128, %s369_s13, %s358_s1  }
  0x5f   : > { %p2935_p3 = scmp.ne.s32.totalorder %s2928_s28, 0 }
  0x60   : > { %p2936_p7 = scmp.eq.s32.totalorder (!%p2935_p3), %s2548_s27, 0 }
  0x61   : > { %377 = sbr.rel (%p2935_p3) target bundleno = 3457 (0xd81), region = 56 }
  0x66   : > { %2398 = dma.done.wait (%p2936_p7), [#allocation7], 32   ;;  %p2937_p13 = pmov %p2936_p7 }
  0x67   : > { %p2938_p2 = pmov %p2936_p7 }
  0x68   : > { %2400 = vsyncadd (%p2937_p13), [#allocation7], 4294967264 }
  0x69   : > { %2402 = dma.done.wait (%p2938_p2), [#allocation10], 32   ;;  %p2939_p5 = pmov %p2938_p2 }
  0x6a   : > { %s387_s2 = sand.u32 1, %s2548_s27   ;;  %s389_s1 = sand.u32 1, %s2433_s22  }
  0x6b   : > { %2404 = vsyncadd (%p2939_p5), [#allocation10], 4294967264  ;;  %s2667_s8 = sshll.u32 %s389_s1, 3  ;;  %s388_s28 = scalar_lea.sflag [#allocation7], %s387_s2 }
  0x6c   : > { %p2940_p1 = scmp.ne.s32.totalorder %s2933_s17, 0 }
  0x6e   : > { %2406 = dma.done.wait (%p2940_p1), %s388_s28, 128  }
  0x6f   : > { %2408 = vsyncadd (%p2940_p1), %s388_s28, 4294967168  ;;  %p2941_p4 = pmov %p2938_p2 }
  0x70   : > { %p2942_p10 = pmov %p2938_p2 }
  0x71   : > { %2410 = dma.done.wait (%p2941_p4), [#allocation10], 16  }
  0x72   : > { %2412 = vsyncadd (%p2942_p10), [#allocation10], 4294967280  ;;  %p2943_p6 = pmov %p2938_p2 }
  0x73   : > { %p2944_p8 = pmov %p2938_p2 }
  0x74   : > { %2414 = dma.done.wait (%p2943_p6), [#allocation14], 16  }
  0x75   : > { %2416 = vsyncadd (%p2944_p8), [#allocation14], 4294967280  ;;  %p449_p9 = scmp.lt.s32.totalorder %s2548_s27, 1  ;;  %p2945_p11 = scmp.ne.s32.totalorder %s2548_s27, 0 }
  0x77   : > { %s450_s13 = scalar_select %p449_p9, %s2548_s27, 1 }
  0x78   : > { %473 = sbr.rel (%p2945_p11) target bundleno = 450 (0x1c2), region = 80 }
  0x79   : > { %s1883_s26 = sshll.u32 %s450_s13, 4  ;;  %s1886_s24 = sshll.u32 %s450_s13, 5 }
  0x7a   : > { %s2687_s20 = scalar_lea.vmem %s2912_s3, %s1883_s26  ;;  %s2692_s29 = scalar_lea.vmem %s2913_s4, %s1883_s26 }
  0x7b   : > { %s2697_s2 = scalar_lea.vmem %s2914_s5, %s1883_s26  ;;  %s2702_s14 = scalar_lea.vmem %s2915_s6, %s1886_s24 }
  0x7c   : > { %s2450_s13 = smov (!%p2945_p11), [#allocation2]  }
  0x7d   : > { %s481_s17 = sshll.u32 %s2450_s13, 4  ;;  %s482_s17 = int_to_ptr.vmem [resolvable:$true] %s481_s17 }
  0x7e   : > { %s2325_s30 = scalar_lea.vmem %s482_s17, 256  ;;  %p2330_p0 = scmp.lt.s32.totalorder %s482_s17, %s482_s17 }
  0x7f   : > { %p2326_p12 = scmp.ne.s32.totalorder %s482_s17, %s2325_s30  ;;  %p2331_p3 = scmp.lt.s32.totalorder %s2325_s30, %s2325_s30 }
  0x81   : > { %p2332_p7 = por %p2331_p3, %p2330_p0 }
  0x83   : > { %p2333_p13 = pnand %p2332_p7, %p2326_p12 }
  0x85   : > { %2336 = shalt.err (!%p2333_p13)  }
  0x86   : > { %484 = dma.hbm_to_vmem [thread:$0]  %s2909_s0, 256, %s482_s17, [#allocation5] }
  0x87   : > { %2417 = dma.done.wait [#allocation5], 256 }
  0x88   : > { %2418 = vsyncadd [#allocation5], 4294967040  ;;  %vm492_vm0 = vcmask 261120   ;;  %v488_v0 = vld [vmem:[#allocation2] sm:$0xff]  ;;  %v489_v1 = vld [vmem:[#allocation2 + $0x8] sm:$0xff] }
  0x89   : > { %v493_v2 = vsel %vm492_vm0, %v488_v0, 0.0  ;;  %v496_v3 = vsel %vm492_vm0, %v489_v1, 0.0  ;;  %v1840_v21 = vld [vmem:[#allocation9] ss:$0 sm:$0xff]  ;;  %v1841_v23 = vld [vmem:[#allocation9 + $0x1] ss:$0 sm:$0xff] }
  0x8a   : > { %494 = vadd.xlane.f32.xlu0 %v493_v2 }
  0x8e   : > { %497 = vadd.xlane.f32.xlu0 %v496_v3 }
 0x113   : > { %v495_v4 = vpop.xlane.xlu0 %494 }
 0x114   : > { %v500_v5 = vmul.f32 0.03125, %v495_v4 }
 0x116   : > { %v502_v6 = vsub.f32 %v488_v0, %v500_v5 }
 0x117   : > { %v498_v7 = vpop.xlane.xlu0 %497 }
 0x118   : > { %v501_v8 = vmul.f32 0.03125, %v498_v7  ;;  %v504_v9 = vmul.f32 %v502_v6, %v502_v6 }
 0x11a   : > { %v503_v10 = vsub.f32 %v489_v1, %v501_v8  ;;  %v506_v11 = vsel %vm492_vm0, %v504_v9, 0.0 }
 0x11b   : > { %507 = vadd.xlane.f32.xlu1 %v506_v11 }
 0x11c   : > { %v505_v12 = vmul.f32 %v503_v10, %v503_v10 }
 0x11e   : > { %v509_v13 = vsel %vm492_vm0, %v505_v12, 0.0 }
 0x11f   : > { %510 = vadd.xlane.f32.xlu1 %v509_v13 }
 0x1a4   : > { %v508_v14 = vpop.xlane.xlu1 %507 }
 0x1a5   : > { %v512_v15 = vmul.f32 0.03125, %v508_v14 }
 0x1a7   : > { %v514_v16 = vadd.f32 1e-12, %v512_v15 }
 0x1a8   : > { %v511_v17 = vpop.xlane.xlu1 %510 }
 0x1a9   : > { %2123 = vrsqrt.f32 %v514_v16  ;;  %v513_v18 = vmul.f32 0.03125, %v511_v17 }
 0x1ab   : > { %v515_v19 = vadd.f32 1e-12, %v513_v18 }
 0x1ad   : > { %2125 = vrsqrt.f32 %v515_v19 }
 0x1b6   : > { %v2124_v20 = vpop.eup %2123 }
 0x1b7   : > { %v518_v22 = vmul.f32 %v2124_v20, %v502_v6 }
 0x1b9   : > { %v524_v24 = vmul.f32 %v1840_v21, %v518_v22 }
 0x1ba   : > { %v2126_v25 = vpop.eup %2125 }
 0x1bb   : > { %v530_v26 = vadd.f32 %v1841_v23, %v524_v24  ;;  %v519_v27 = vmul.f32 %v2126_v25, %v503_v10 }
 0x1bd   : > { %532 = vst.msk [vmem:[#allocation2] sm:$0xff] %vm492_vm0, %v530_v26  ;;  %v525_v28 = vmul.f32 %v1840_v21, %v519_v27 }
 0x1bf   : > { %v531_v29 = vadd.f32 %v1841_v23, %v525_v28 }
 0x1c1   : > { %533 = vst.msk [vmem:[#allocation2 + $0x8] sm:$0xff] %vm492_vm0, %v531_v29 }
 0x1c2 PF: > { %p1842_p2 = scmp.ne.s32.totalorder %s2548_s27, 1 }
 0x1c4   : > { %537 = sbr.rel (%p1842_p2) target bundleno = 470 (0x1d6), region = 88 }
 0x1c9   : > { %v572_v30 = vld [vmem:[%s2919_s10] sm:$0xff]  ;;  %v574_v31 = vld [vmem:[%s2919_s10 + $0x8] sm:$0xff] }
 0x1ca   : > { %573 = vst [vmem:[#allocation3] sm:$0xff] %v572_v30  ;;  %575 = vst [vmem:[#allocation3 + $0x8] sm:$0xff] %v574_v31 }
 0x1cb   : > { %583 = vsyncadd [#allocation5 + $0x1], 256  ;;  %s2451_s1 = smov [#allocation4]  }
 0x1cc   : > { %s592_s28 = sshll.u32 %s2451_s1, 4  ;;  %s593_s28 = int_to_ptr.vmem [resolvable:$true] %s592_s28 }
 0x1cd   : > { %s2345_s13 = scalar_lea.vmem %s593_s28, 256  ;;  %p2350_p1 = scmp.lt.s32.totalorder %s593_s28, %s593_s28 }
 0x1ce   : > { %p2346_p5 = scmp.ne.s32.totalorder %s593_s28, %s2345_s13  ;;  %p2351_p4 = scmp.lt.s32.totalorder %s2345_s13, %s2345_s13 }
 0x1d0   : > { %p2352_p10 = por %p2351_p4, %p2350_p1 }
 0x1d2   : > { %p2353_p6 = pnand %p2352_p10, %p2346_p5 }
 0x1d4   : > { %2356 = shalt.err (!%p2353_p6)  }
 0x1d5   : > { %595 = dma.hbm_to_vmem [thread:$0]  %s2920_s11, 256, %s593_s28, [#allocation5 + $0x2] }
 0x1d6 PF: > { %v2137_v32 = vld [vmem:[%s2687_s20 + $0x8] sm:$0xff]   ;;  %v2452_v33 = vmov 0.0   ;;  %v2138_v34 = vld [vmem:[%s2687_s20] sm:$0xff]   ;;  %vm2453_vm1 = vmmov 0   ;;  %vm620_vm2 = vcmask 261120   ;;  %v604_v38 = vlaneseq  ;;  %s2946_s20 = scalar_lea.vmem [#allocation11], %s2667_s8 }
 0x1d7   : > { %1923 = vmatprep.subr.bf16.mxu0 %v2452_v33  ;;  %1931 = vmatprep.subr.bf16.mxu1 %v2452_v33  ;;  %v2733_v35 = vld [vmem:[#allocation2] sm:$0xff]  ;;  %v2735_v36 = vld [vmem:[#allocation2 + $0x8] sm:$0xff]  ;;  %s2454_s26 = smov 112   ;;  %s2455_s25 = smov 96   ;;  %vm694_vm3 = vcmask 130048   ;;  %vm888_vm4 = vcmask 64512  }
 0x1d8   : > { %1924 = vmatpush3.bf16.msra.mxu0 %v2137_v32  ;;  %1927 = vmatprep.mubr.msk.bf16.mxu0 %vm2453_vm1, %v2452_v33  ;;  %v598_v37 = vpack.c.bf16 %v2735_v36, %v2733_v35  ;;  %v2746_v39 = vshrl.u32 %v604_v38, 7  ;;  %v2751_v41 = vld [vmem:[%s2946_s20] sm:$0xff]  ;;  %v1847_v1 = vld [vmem:[#allocation6 + $0x1] ss:$0 sm:$0xff]  ;;  %v1846_v5 = vld [vmem:[#allocation6] ss:$0 sm:$0xff] }
 0x1d9   : > { %1925 = vmatprep.subr.bf16.mxu0 %v2452_v33  ;;  %1933 = vmatprep.mubr.msk.bf16.mxu1 %vm2453_vm1, %v2452_v33  ;;  %s2456_s8 = smov 64   ;;  %vm942_vm5 = vcmask 1043456   ;;  %s2457_s24 = smov 16   ;;  %vm1402_vm8 = vcmask 523264  }
 0x1da   : > { %v606_v40 = vsub.s32 0, %v2746_v39 }
 0x1dc   : > { %1926 = vmatpush3.bf16.msra.mxu0 %v2138_v34  ;;  %v607_v43 = vrot.slane %v2751_v41, %v606_v40 }
 0x1dd   : > { %1937 = vmatprep.subr.bf16.mxu0 %v2452_v33 }
 0x1df   : > { %1928 = vmatmul.mubr.msk.bf16.vlgmr.msra.gmra.mxu0 %vm620_vm2, %v598_v37 }
 0x1e0   : > { %1939 = vmatprep.mubr.msk.bf16.mxu0 %vm2453_vm1, %v2452_v33 }
 0x29f   : > { %v658_v42 = vpop.f32.mrf.mxu0 }
 0x2a0   : > { %v659_v46 = vadd.f32 %v658_v42, %v607_v43 }
 0x2a1   : > { %v1929_v44 = vpop.f32.mrf.mxu0 }
 0x2a2   : > { %v2757_v51 = vpack.c.bf16 %v659_v46, %v659_v46 }
 0x2a3   : > { %v661_v45 = vpop.f32.mrf.mxu0 }
 0x2a4   : > { %v662_v47 = vadd.f32 %v661_v45, %v607_v43 }
 0x2a5   : > { %v1930_v48 = vpop.f32.mrf.mxu0 }
 0x2a6   : > { %v2754_v49 = vpack.c.bf16 %v662_v47, %v662_v47  ;;  %v2127_v50 = vpack.i.bf16 %v662_v47, %v659_v46 }
 0x2a8   : > { %2128 = vrot.lane.b32.xlu0 %v2127_v50, %s2454_s26  ;;  %742 = vrot.lane.b32.xlu1 %v2754_v49, %s2455_s25 }
 0x2ac   : > { %692 = vrot.lane.b32.xlu0 %v2757_v51, %s2455_s25 }
 0x31a   : > { %v2129_v52 = vpop.permute.xlu0 %2128  ;;  %v743_v53 = vpop.permute.xlu1 %742 }
 0x31b   : > { %v2131_v54 = vunpack.i.h.bf16 %v2129_v52  ;;  %v2130_v55 = vunpack.i.l.bf16 %v2129_v52  ;;  %v748_v56 = vsel %vm694_vm3, %v743_v53, 0 }
 0x31c   : > { %1938 = vmatpush3.bf16.xpose.msra.mxu0 %v748_v56 }
 0x31d   : > { %v2761_v57 = vpack.c.bf16 %v2131_v54, %v2131_v54  ;;  %v2763_v58 = vpack.c.bf16 %v2130_v55, %v2130_v55  ;;  %1949 = vmatprep.subr.bf16.mxu0 %v2452_v33 }
 0x31e   : > { %v693_v59 = vpop.permute.xlu0 %692 }
 0x31f   : > { %840 = vrot.lane.b32.xlu0 %v2761_v57, %s2455_s25  ;;  %791 = vrot.lane.b32.xlu1 %v2763_v58, %s2455_s25  ;;  %v699_v60 = vsel %vm694_vm3, %v693_v59, 0 }
 0x320   : > { %1932 = vmatpush3.bf16.xpose.msra.mxu1 %v699_v60 }
 0x321   : > { %1943 = vmatprep.subr.bf16.mxu1 %v2452_v33 }
 0x323   : > { %1940 = vmatmul.mubr.msk.bf16.vlgmr.msra.gmra.mxu0 %vm694_vm3, %v2754_v49 }
 0x324   : > { %1951 = vmatprep.mubr.msk.bf16.mxu0 %vm2453_vm1, %v2452_v33 }
 0x327   : > { %1934 = vmatmul.mubr.msk.bf16.vlgmr.msra.gmra.mxu1 %vm694_vm3, %v2757_v51 }
 0x328   : > { %1945 = vmatprep.mubr.msk.bf16.mxu1 %vm2453_vm1, %v2452_v33 }
 0x391   : > { %v841_v61 = vpop.permute.xlu0 %840  ;;  %v792_v62 = vpop.permute.xlu1 %791 }
 0x392   : > { %v846_v63 = vsel %vm694_vm3, %v841_v61, 0  ;;  %v797_v0 = vsel %vm694_vm3, %v792_v62, 0 }
 0x393   : > { %1944 = vmatpush3.bf16.xpose.msra.mxu1 %v797_v0  ;;  %1950 = vmatpush3.bf16.xpose.msra.mxu0 %v846_v63 }
 0x394   : > { %1955 = vmatprep.subr.bf16.mxu1 %v2452_v33  ;;  %1961 = vmatprep.subr.bf16.mxu0 %v2452_v33 }
 0x39a   : > { %1946 = vmatmul.mubr.msk.bf16.vlgmr.msra.gmra.mxu1 %vm694_vm3, %v2763_v58  ;;  %1952 = vmatmul.mubr.msk.bf16.vlgmr.msra.gmra.mxu0 %vm694_vm3, %v2761_v57 }
 0x39b   : > { %1957 = vmatprep.mubr.msk.bf16.mxu1 %vm2453_vm1, %v2452_v33  ;;  %1963 = vmatprep.mubr.msk.bf16.mxu0 %vm2453_vm1, %v2452_v33 }
 0x3e3   : > { %v784_v2 = vpop.f32.mrf.mxu0 }
 0x3e4   : > { %v785_v3 = vadd.f32 %v1847_v1, %v784_v2 }
 0x3e5   : > { %v1941_v4 = vpop.f32.mrf.mxu0 }
 0x3e6   : > { %v892_v6 = vsel %vm888_vm4, %v785_v3, -inf }
 0x3e7   : > { %v735_v7 = vpop.f32.mrf.mxu1  ;;  %893 = vmax.xlane.f32.xlu0 %v892_v6  ;;  %v787_v8 = vpop.f32.mrf.mxu0 }
 0x3e8   : > { %v736_v9 = vadd.f32 %v1846_v5, %v735_v7 }
 0x3e9   : > { %v1935_v10 = vpop.f32.mrf.mxu1  ;;  %v1942_v11 = vpop.f32.mrf.mxu0 }
 0x3ea   : > { %v889_v12 = vsel %vm888_vm4, %v736_v9, -inf }
 0x3eb   : > { %v738_v13 = vpop.f32.mrf.mxu1  ;;  %890 = vmax.xlane.f32.xlu1 %v889_v12  ;;  %v2139_v12 = vld [vmem:[%s2692_s29 + $0x8] sm:$0xff]  }
 0x3ed   : > { %v1936_v14 = vpop.f32.mrf.mxu1 }
 0x45a   : > { %v833_v15 = vpop.f32.mrf.mxu1  ;;  %v882_v16 = vpop.f32.mrf.mxu0 }
 0x45b   : > { %v834_v17 = vadd.f32 %v1846_v5, %v833_v15  ;;  %v883_v18 = vadd.f32 %v1847_v1, %v882_v16 }
 0x45c   : > { %v1947_v19 = vpop.f32.mrf.mxu1  ;;  %v1953_v20 = vpop.f32.mrf.mxu0 }
 0x45d   : > { %v895_v21 = vsel %vm888_vm4, %v834_v17, -inf  ;;  %v898_v22 = vsel %vm888_vm4, %v883_v18, -inf }
 0x45e   : > { %v836_v23 = vpop.f32.mrf.mxu1  ;;  %896 = vmax.xlane.f32.xlu0 %v895_v21  ;;  %899 = vmax.xlane.f32.xlu1 %v898_v22  ;;  %v885_v24 = vpop.f32.mrf.mxu0  ;;  %v2140_v21 = vld [vmem:[%s2692_s29] sm:$0xff]  }
 0x460   : > { %v1948_v25 = vpop.f32.mrf.mxu1  ;;  %v1954_v26 = vpop.f32.mrf.mxu0 }
 0x46f   : > { %986 = vrot.lane.b32.xlu1 %v2754_v49, %s2456_s8 }
 0x470   : > { %v894_v27 = vpop.xlane.xlu0 %893 }
 0x471   : > { %v902_v29 = vsub.f32 %v785_v3, %v894_v27 }
 0x473   : > { %v907_v31 = vmul.f32 1.442695, %v902_v29 }
 0x474   : > { %937 = vrot.lane.b32.xlu0 %v2757_v51, %s2456_s8  ;;  %v891_v28 = vpop.xlane.xlu1 %890 }
 0x475   : > { %v901_v30 = vsub.f32 %v736_v9, %v891_v28  ;;  %2147 = vpow2.f32 %v907_v31 }
 0x477   : > { %v905_v32 = vmul.f32 1.442695, %v901_v30 }
 0x479   : > { %2149 = vpow2.f32 %v905_v32 }
 0x482   : > { %v2148_v34 = vpop.eup %2147 }
 0x483   : > { %v916_v40 = vsel %vm888_vm4, %v2148_v34, 0.0 }
 0x486   : > { %v2150_v37 = vpop.eup %2149 }
 0x487   : > { %v913_v38 = vsel %vm888_vm4, %v2150_v37, 0.0 }
 0x493   : > { %914 = vadd.xlane.f32.xlu0 %v913_v38  ;;  %917 = vadd.xlane.f32.xlu1 %v916_v40 }
 0x4e7   : > { %v897_v42 = vpop.xlane.xlu0 %896  ;;  %v900_v43 = vpop.xlane.xlu1 %899 }
 0x4e8   : > { %v903_v44 = vsub.f32 %v834_v17, %v897_v42  ;;  %v904_v45 = vsub.f32 %v883_v18, %v900_v43  ;;  %v1147_v42 = vsub.s32 1, %v2746_v39 }
 0x4ea   : > { %v909_v46 = vmul.f32 1.442695, %v903_v44  ;;  %v911_v47 = vmul.f32 1.442695, %v904_v45  ;;  %v1148_v43 = vrot.slane %v2751_v41, %v1147_v42 }
 0x4eb   : > { %v938_v48 = vpop.permute.xlu0 %937  ;;  %v987_v49 = vpop.permute.xlu1 %986 }
 0x4ec   : > { %2151 = vpow2.f32 %v909_v46  ;;  %v944_v50 = vsel %vm942_vm5, %v938_v48, 0  ;;  %v992_v51 = vsel %vm942_vm5, %v987_v49, 0 }
 0x4ed   : > { %2153 = vpow2.f32 %v911_v47  ;;  %1956 = vmatpush3.bf16.msra.mxu1 %v944_v50  ;;  %1962 = vmatpush3.bf16.msra.mxu0 %v992_v51 }
 0x4ee   : > { %1967 = vmatprep.subr.bf16.mxu1 %v2452_v33  ;;  %1973 = vmatprep.subr.bf16.mxu0 %v2452_v33 }
 0x4f9   : > { %v2152_v52 = vpop.eup %2151 }
 0x4fa   : > { %v2154_v53 = vpop.eup %2153  ;;  %v919_v54 = vsel %vm888_vm4, %v2152_v52, 0.0 }
 0x4fb   : > { %920 = vadd.xlane.f32.xlu0 %v919_v54  ;;  %v922_v55 = vsel %vm888_vm4, %v2154_v53, 0.0 }
 0x4fc   : > { %923 = vadd.xlane.f32.xlu1 %v922_v55 }
 0x50d   : > { %1034 = vrot.lane.b32.xlu1 %v2763_v58, %s2456_s8 }
 0x511   : > { %1082 = vrot.lane.b32.xlu0 %v2761_v57, %s2456_s8 }
 0x51c   : > { %v915_v56 = vpop.xlane.xlu0 %914  ;;  %v918_v59 = vpop.xlane.xlu1 %917 }
 0x51d   : > { %2155 = vrcp.f32 %v915_v56 }
 0x51e   : > { %2157 = vrcp.f32 %v918_v59 }
 0x52a   : > { %v2156_v60 = vpop.eup %2155 }
 0x52b   : > { %v2158_v61 = vpop.eup %2157  ;;  %v929_v62 = vmul.f32 %v2156_v60, %v2150_v37 }
 0x52c   : > { %v930_v63 = vmul.f32 %v2158_v61, %v2148_v34 }
 0x52d   : > { %v933_v0 = vpack.c.bf16 %v929_v62, %v929_v62 }
 0x52e   : > { %v934_v1 = vpack.c.bf16 %v930_v63, %v930_v63 }
 0x52f   : > { %1958 = vmatmul.mubr.msk.bf16.vlgmr.msra.gmra.mxu1 %vm888_vm4, %v933_v0 }
 0x530   : > { %1964 = vmatmul.mubr.msk.bf16.vlgmr.msra.gmra.mxu0 %vm888_vm4, %v934_v1  ;;  %1969 = vmatprep.mubr.msk.bf16.mxu1 %vm2453_vm1, %v2452_v33  ;;  %v2141_v1 = vld [vmem:[%s2697_s2 + $0x8] sm:$0xff]  }
 0x531   : > { %1975 = vmatprep.mubr.msk.bf16.mxu0 %vm2453_vm1, %v2452_v33 }
 0x584   : > { %v921_v57 = vpop.xlane.xlu0 %920 }
 0x585   : > { %2159 = vrcp.f32 %v921_v57  ;;  %v924_v58 = vpop.xlane.xlu1 %923 }
 0x586   : > { %2161 = vrcp.f32 %v924_v58 }
 0x588   : > { %v1083_v2 = vpop.permute.xlu0 %1082 }
 0x589   : > { %v1088_v3 = vsel %vm942_vm5, %v1083_v2, 0  ;;  %v1035_v4 = vpop.permute.xlu1 %1034 }
 0x58a   : > { %v1040_v5 = vsel %vm942_vm5, %v1035_v4, 0  ;;  %1974 = vmatpush3.bf16.msra.mxu0 %v1088_v3 }
 0x58b   : > { %1968 = vmatpush3.bf16.msra.mxu1 %v1040_v5  ;;  %1987 = vmatprep.subr.bf16.mxu0 %v2452_v33 }
 0x58c   : > { %1979 = vmatprep.subr.bf16.mxu1 %v2452_v33 }
 0x592   : > { %v2160_v6 = vpop.eup %2159 }
 0x593   : > { %v2162_v7 = vpop.eup %2161  ;;  %v931_v8 = vmul.f32 %v2160_v6, %v2152_v52  ;;  %v1236_v6 = vsub.s32 2, %v2746_v39 }
 0x594   : > { %v932_v9 = vmul.f32 %v2162_v7, %v2154_v53 }
 0x595   : > { %v935_v10 = vpack.c.bf16 %v931_v8, %v931_v8 }
 0x596   : > { %v936_v11 = vpack.c.bf16 %v932_v9, %v932_v9  ;;  %v1237_v9 = vrot.slane %v2751_v41, %v1236_v6 }
 0x597   : > { %1970 = vmatmul.mubr.msk.bf16.vlgmr.msra.gmra.mxu1 %vm888_vm4, %v935_v10  ;;  %v1242_v10 = vsub.s32 3, %v2746_v39 }
 0x598   : > { %1976 = vmatmul.mubr.msk.bf16.vlgmr.msra.gmra.mxu0 %vm888_vm4, %v936_v11  ;;  %1983 = vmatprep.mubr.msk.bf16.mxu1 %vm2453_vm1, %v2452_v33 }
 0x599   : > { %1991 = vmatprep.mubr.msk.bf16.mxu0 %vm2453_vm1, %v2452_v33  ;;  %1980 = vmatpush3.bf16.msra.mxu1 %v2139_v12 }
 0x59a   : > { %1981 = vmatprep.subr.bf16.mxu1 %v2452_v33  ;;  %1988 = vmatpush3.bf16.msra.mxu0 %v2141_v1 }
 0x59b   : > { %1989 = vmatprep.subr.bf16.mxu0 %v2452_v33 }
 0x59d   : > { %1982 = vmatpush3.bf16.msra.mxu1 %v2140_v21  ;;  %v2145_v21 = vld [vmem:[%s2702_s14 + $0x8] sm:$0xff]  }
 0x59e   : > { %1995 = vmatprep.subr.bf16.mxu1 %v2452_v33 }
 0x5ef   : > { %v980_v13 = vpop.f32.mrf.mxu1 }
 0x5f0   : > { %v1028_v14 = vpop.f32.mrf.mxu0 }
 0x5f1   : > { %v1959_v15 = vpop.f32.mrf.mxu1 }
 0x5f2   : > { %v1965_v16 = vpop.f32.mrf.mxu0 }
 0x5f3   : > { %v983_v17 = vpop.f32.mrf.mxu1 }
 0x5f4   : > { %v1031_v18 = vpop.f32.mrf.mxu0 }
 0x5f5   : > { %v1960_v19 = vpop.f32.mrf.mxu1 }
 0x5f6   : > { %v1966_v20 = vpop.f32.mrf.mxu0  ;;  %v2143_v19 = vld [vmem:[%s2702_s14 + $0x18] sm:$0xff]  }
 0x5f7   : > { %v2144_v20 = vld [vmem:[%s2702_s14 + $0x10] sm:$0xff]  }
 0x657   : > { %v1076_v22 = vpop.f32.mrf.mxu1 }
 0x658   : > { %v1124_v23 = vpop.f32.mrf.mxu0 }
 0x659   : > { %v2132_v24 = vpack.i.bf16 %v1124_v23, %v1076_v22  ;;  %v1971_v25 = vpop.f32.mrf.mxu1  ;;  %v2146_v22 = vld [vmem:[%s2702_s14] sm:$0xff]   ;;  %v1253_v23 = vsub.s32 4, %v2746_v39 }
 0x65a   : > { %v1977_v26 = vpop.f32.mrf.mxu0 }
 0x65b   : > { %2133 = vrot.lane.b32.xlu1 %v2132_v24, %s2457_s24  ;;  %v1079_v27 = vpop.f32.mrf.mxu1  ;;  %v1254_v24 = vrot.slane %v2751_v41, %v1253_v23  ;;  %v1376_v23 = vsub.s32 5, %v2746_v39 }
 0x65c   : > { %v1127_v28 = vpop.f32.mrf.mxu0 }
 0x65d   : > { %v1972_v29 = vpop.f32.mrf.mxu1 }
 0x65e   : > { %v1978_v30 = vpop.f32.mrf.mxu0 }
 0x6cd   : > { %v2134_v31 = vpop.permute.xlu1 %2133 }
 0x6ce   : > { %v2136_v32 = vunpack.i.h.bf16 %v2134_v31  ;;  %v2135_v34 = vunpack.i.l.bf16 %v2134_v31 }
 0x6d0   : > { %v1139_v37 = vsel %vm694_vm3, %v1028_v14, %v2136_v32  ;;  %v1138_v38 = vsel %vm694_vm3, %v980_v13, %v2135_v34  ;;  %v1243_v14 = vrot.slane %v2751_v41, %v1242_v10 }
 0x6d1   : > { %v1140_v40 = vpack.c.bf16 %v1139_v37, %v1138_v38 }
 0x6d3   : > { %1984 = vmatmul.mubr.msk.bf16.vlgmr.msra.gmra.mxu1 %vm620_vm2, %v1140_v40 }
 0x6d4   : > { %2003 = vmatprep.mubr.msk.bf16.mxu1 %vm2453_vm1, %v2452_v33  ;;  %1996 = vmatpush3.bf16.msra.mxu1 %v2143_v19 }
 0x6d5   : > { %1997 = vmatprep.subr.bf16.mxu1 %v2452_v33 }
 0x6d8   : > { %1998 = vmatpush3.bf16.msra.mxu1 %v2144_v20 }
 0x6d9   : > { %1999 = vmatprep.subr.bf16.mxu1 %v2452_v33 }
 0x6dc   : > { %2000 = vmatpush3.bf16.msra.mxu1 %v2145_v21 }
 0x6dd   : > { %2001 = vmatprep.subr.bf16.mxu1 %v2452_v33 }
 0x6e0   : > { %2002 = vmatpush3.bf16.msra.mxu1 %v2146_v22 }
 0x793   : > { %v1198_v44 = vpop.f32.mrf.mxu1 }
 0x794   : > { %v1199_v45 = vadd.f32 %v1198_v44, %v1148_v43 }
 0x795   : > { %v1985_v46 = vpop.f32.mrf.mxu1 }
 0x796   : > { %v1205_v47 = vadd.f32 %v1199_v45, %v2733_v35 }
 0x797   : > { %v1201_v48 = vpop.f32.mrf.mxu1 }
 0x798   : > { %v1202_v49 = vadd.f32 %v1201_v48, %v1148_v43  ;;  %v1207_v50 = vsel %vm620_vm2, %v1205_v47, 0.0 }
 0x799   : > { %1208 = vadd.xlane.f32.xlu0 %v1207_v50  ;;  %v1986_v51 = vpop.f32.mrf.mxu1 }
 0x79a   : > { %v1206_v52 = vadd.f32 %v1202_v49, %v2735_v36  ;;  %v2142_v36 = vld [vmem:[%s2697_s2] sm:$0xff]  }
 0x79b   : > { %1990 = vmatpush3.bf16.msra.mxu0 %v2142_v36 }
 0x79c   : > { %v1210_v53 = vsel %vm620_vm2, %v1206_v52, 0.0 }
 0x79d   : > { %1211 = vadd.xlane.f32.xlu1 %v1210_v53 }
 0x822   : > { %v1209_v54 = vpop.xlane.xlu0 %1208 }
 0x823   : > { %v1214_v55 = vmul.f32 0.03125, %v1209_v54 }
 0x825   : > { %v1216_v56 = vsub.f32 %v1205_v47, %v1214_v55 }
 0x826   : > { %v1212_v59 = vpop.xlane.xlu1 %1211 }
 0x827   : > { %v1215_v60 = vmul.f32 0.03125, %v1212_v59  ;;  %v1218_v61 = vmul.f32 %v1216_v56, %v1216_v56 }
 0x829   : > { %v1217_v35 = vsub.f32 %v1206_v52, %v1215_v60  ;;  %v1220_v62 = vsel %vm620_vm2, %v1218_v61, 0.0 }
 0x82a   : > { %1221 = vadd.xlane.f32.xlu0 %v1220_v62 }
 0x82b   : > { %v1219_v63 = vmul.f32 %v1217_v35, %v1217_v35 }
 0x82d   : > { %v1223_v0 = vsel %vm620_vm2, %v1219_v63, 0.0 }
 0x82e   : > { %1224 = vadd.xlane.f32.xlu0 %v1223_v0 }
 0x8b3   : > { %v1222_v57 = vpop.xlane.xlu0 %1221 }
 0x8b4   : > { %v1226_v58 = vmul.f32 0.03125, %v1222_v57 }
 0x8b6   : > { %v1228_v2 = vadd.f32 1e-12, %v1226_v58 }
 0x8b7   : > { %v1225_v3 = vpop.xlane.xlu0 %1224 }
 0x8b8   : > { %2163 = vrsqrt.f32 %v1228_v2  ;;  %v1227_v4 = vmul.f32 0.03125, %v1225_v3 }
 0x8ba   : > { %v1229_v5 = vadd.f32 1e-12, %v1227_v4 }
 0x8bc   : > { %2165 = vrsqrt.f32 %v1229_v5 }
 0x8c5   : > { %v2164_v7 = vpop.eup %2163 }
 0x8c6   : > { %v1232_v8 = vmul.f32 %v2164_v7, %v1216_v56  ;;  %v2458_v7 = vmov -1.0  }
 0x8c8   : > { %v1238_v13 = vmul.f32 %v1237_v9, %v1232_v8 }
 0x8c9   : > { %v2166_v11 = vpop.eup %2165 }
 0x8ca   : > { %v1233_v12 = vmul.f32 %v2166_v11, %v1217_v35  ;;  %v2850_v16 = vadd.f32 %v1243_v14, %v1238_v13 }
 0x8cc   : > { %v1239_v15 = vmul.f32 %v1237_v9, %v1233_v12 }
 0x8ce   : > { %v2852_v17 = vadd.f32 %v1243_v14, %v1239_v15 }
 0x8d0   : > { %v1246_v18 = vpack.c.bf16 %v2852_v17, %v2850_v16 }
 0x8d2   : > { %1992 = vmatmul.mubr.msk.bf16.vlgmr.msra.gmra.mxu0 %vm620_vm2, %v1246_v18 }
 0x992   : > { %v1304_v25 = vpop.f32.mrf.mxu0 }
 0x993   : > { %v1305_v26 = vadd.f32 %v1304_v25, %v1254_v24 }
 0x994   : > { %v1993_v27 = vpop.f32.mrf.mxu0 }
 0x995   : > { %v1313_v28 = vmul.f32 0.70710677, %v1305_v26  ;;  %v1311_v15 = vmul.f32 0.5, %v1305_v26 }
 0x996   : > { %v1307_v29 = vpop.f32.mrf.mxu0 }
 0x997   : > { %v1319_v30 = vand.u32 2147483647, %v1313_v28  ;;  %v1308_v31 = vadd.f32 %v1307_v29, %v1254_v24  ;;  %vm1315_vm6 = vcmp.ge.f32.partialorder %v1313_v28, 0.0  ;;  %v1377_v24 = vrot.slane %v2751_v41, %v1376_v23 }
 0x998   : > { %v1994_v32 = vpop.f32.mrf.mxu0  ;;  %v1317_v8 = vsel %vm1315_vm6, 1.0, %v2458_v7 }
 0x999   : > { %v1321_v34 = vmul.f32 0.3275911, %v1319_v30  ;;  %v1314_v37 = vmul.f32 0.70710677, %v1308_v31  ;;  %v1347_v43 = vsub.f32 0.0, %v1319_v30  ;;  %v1312_v18 = vmul.f32 0.5, %v1308_v31 }
 0x99b   : > { %v1323_v38 = vadd.f32 1.0, %v1321_v34  ;;  %v1320_v40 = vand.u32 2147483647, %v1314_v37  ;;  %v1349_v44 = vmul.f32 %v1347_v43, %v1319_v30  ;;  %vm1316_vm7 = vcmp.ge.f32.partialorder %v1314_v37, 0.0 }
 0x99c   : > { %v1318_v12 = vsel %vm1316_vm7, 1.0, %v2458_v7 }
 0x99d   : > { %2167 = vrcp.f32 %v1323_v38  ;;  %v1322_v33 = vmul.f32 0.3275911, %v1320_v40  ;;  %v1348_v45 = vsub.f32 0.0, %v1320_v40  ;;  %v1351_v48 = vmul.f32 1.442695, %v1349_v44 }
 0x99f   : > { %v1324_v42 = vadd.f32 1.0, %v1322_v33  ;;  %v1350_v49 = vmul.f32 %v1348_v45, %v1320_v40 }
 0x9a1   : > { %2169 = vrcp.f32 %v1324_v42  ;;  %v1353_v54 = vmul.f32 1.442695, %v1350_v49 }
 0x9a2   : > { %2171 = vpow2.f32 %v1351_v48 }
 0x9a3   : > { %2173 = vpow2.f32 %v1353_v54  ;;  %v1483_v54 = vsub.s32 7, %v2746_v39 }
 0x9aa   : > { %v2168_v46 = vpop.eup %2167 }
 0x9ab   : > { %v1329_v47 = vmul.f32 1.0614054, %v2168_v46 }
 0x9ad   : > { %v1331_v50 = vadd.f32 -1.4531521, %v1329_v47 }
 0x9ae   : > { %v2170_v51 = vpop.eup %2169 }
 0x9af   : > { %v1333_v52 = vmul.f32 %v2168_v46, %v1331_v50  ;;  %v1330_v53 = vmul.f32 1.0614054, %v2170_v51  ;;  %v2172_v58 = vpop.eup %2171 }
 0x9b0   : > { %v2174_v6 = vpop.eup %2173 }
 0x9b1   : > { %v1335_v55 = vadd.f32 1.4214138, %v1333_v52  ;;  %v1332_v56 = vadd.f32 -1.4531521, %v1330_v53  ;;  %v1477_v53 = vsub.s32 6, %v2746_v39 }
 0x9b3   : > { %v1337_v59 = vmul.f32 %v2168_v46, %v1335_v55  ;;  %v1334_v60 = vmul.f32 %v2170_v51, %v1332_v56  ;;  %v1478_v55 = vrot.slane %v2751_v41, %v1477_v53 }
 0x9b5   : > { %v1339_v61 = vadd.f32 -0.28449672, %v1337_v59  ;;  %v1336_v35 = vadd.f32 1.4214138, %v1334_v60  ;;  %v1484_v59 = vrot.slane %v2751_v41, %v1483_v54 }
 0x9b7   : > { %v1341_v62 = vmul.f32 %v2168_v46, %v1339_v61  ;;  %v1338_v63 = vmul.f32 %v2170_v51, %v1336_v35 }
 0x9b9   : > { %v1343_v0 = vadd.f32 0.2548296, %v1341_v62  ;;  %v1340_v1 = vadd.f32 -0.28449672, %v1338_v63 }
 0x9bb   : > { %v1345_v36 = vmul.f32 %v2168_v46, %v1343_v0  ;;  %v1342_v57 = vmul.f32 %v2170_v51, %v1340_v1 }
 0x9bd   : > { %v1355_v2 = vmul.f32 %v2172_v58, %v1345_v36  ;;  %v1344_v3 = vadd.f32 0.2548296, %v1342_v57 }
 0x9bf   : > { %v1357_v4 = vsub.f32 1.0, %v1355_v2  ;;  %v1346_v5 = vmul.f32 %v2170_v51, %v1344_v3 }
 0x9c1   : > { %v1359_v9 = vmul.f32 %v1357_v4, %v1317_v8  ;;  %v1356_v10 = vmul.f32 %v2174_v6, %v1346_v5 }
 0x9c3   : > { %v1358_v11 = vsub.f32 1.0, %v1356_v10  ;;  %v1361_v13 = vadd.f32 1.0, %v1359_v9 }
 0x9c5   : > { %v1360_v14 = vmul.f32 %v1358_v11, %v1318_v12  ;;  %v1363_v20 = vmul.f32 %v1361_v13, %v1311_v15 }
 0x9c7   : > { %v1362_v19 = vadd.f32 1.0, %v1360_v14 }
 0x9c9   : > { %v1364_v21 = vmul.f32 %v1362_v19, %v1312_v18 }
 0x9cb   : > { %v1365_v22 = vpack.c.bf16 %v1364_v21, %v1363_v20 }
 0x9cd   : > { %2004 = vmatmul.mubr.msk.bf16.vlgmr.msra.gmra.mxu1 %vm1402_vm8, %v1365_v22 }
 0xa8d   : > { %v1440_v25 = vpop.f32.mrf.mxu1 }
 0xa8e   : > { %v1441_v27 = vadd.f32 %v1440_v25, %v1377_v24 }
 0xa8f   : > { %v2005_v28 = vpop.f32.mrf.mxu1 }
 0xa90   : > { %v1447_v29 = vadd.f32 %v1441_v27, %v2850_v16 }
 0xa91   : > { %v1443_v30 = vpop.f32.mrf.mxu1 }
 0xa92   : > { %v1444_v32 = vadd.f32 %v1443_v30, %v1377_v24  ;;  %v1449_v26 = vsel %vm620_vm2, %v1447_v29, 0.0 }
 0xa93   : > { %1450 = vadd.xlane.f32.xlu1 %v1449_v26  ;;  %v2006_v31 = vpop.f32.mrf.mxu1 }
 0xa94   : > { %v1448_v34 = vadd.f32 %v1444_v32, %v2852_v17 }
 0xa96   : > { %v1452_v37 = vsel %vm620_vm2, %v1448_v34, 0.0 }
 0xa97   : > { %1453 = vadd.xlane.f32.xlu0 %v1452_v37 }
 0xb1c   : > { %v1451_v38 = vpop.xlane.xlu1 %1450 }
 0xb1d   : > { %v1455_v40 = vmul.f32 0.03125, %v1451_v38 }
 0xb1f   : > { %v1457_v33 = vsub.f32 %v1447_v29, %v1455_v40 }
 0xb20   : > { %v1454_v42 = vpop.xlane.xlu0 %1453 }
 0xb21   : > { %v1456_v43 = vmul.f32 0.03125, %v1454_v42  ;;  %v1459_v44 = vmul.f32 %v1457_v33, %v1457_v33 }
 0xb23   : > { %v1458_v45 = vsub.f32 %v1448_v34, %v1456_v43  ;;  %v1461_v16 = vsel %vm620_vm2, %v1459_v44, 0.0 }
 0xb24   : > { %1462 = vadd.xlane.f32.xlu1 %v1461_v16 }
 0xb25   : > { %v1460_v46 = vmul.f32 %v1458_v45, %v1458_v45 }
 0xb27   : > { %v1464_v47 = vsel %vm620_vm2, %v1460_v46, 0.0 }
 0xb28   : > { %1465 = vadd.xlane.f32.xlu0 %v1464_v47 }
 0xbad   : > { %v1463_v48 = vpop.xlane.xlu1 %1462 }
 0xbae   : > { %v1467_v49 = vmul.f32 0.03125, %v1463_v48 }
 0xbb0   : > { %v1469_v17 = vadd.f32 1e-12, %v1467_v49 }
 0xbb1   : > { %v1466_v50 = vpop.xlane.xlu0 %1465 }
 0xbb2   : > { %2175 = vrsqrt.f32 %v1469_v17  ;;  %v1468_v51 = vmul.f32 0.03125, %v1466_v50 }
 0xbb4   : > { %v1470_v52 = vadd.f32 1e-12, %v1468_v51 }
 0xbb6   : > { %2177 = vrsqrt.f32 %v1470_v52 }
 0xbbf   : > { %v2176_v56 = vpop.eup %2175 }
 0xbc0   : > { %v1473_v60 = vmul.f32 %v2176_v56, %v1457_v33 }
 0xbc2   : > { %v1479_v61 = vmul.f32 %v1478_v55, %v1473_v60 }
 0xbc3   : > { %v2178_v35 = vpop.eup %2177 }
 0xbc4   : > { %v1485_v62 = vadd.f32 %v1484_v59, %v1479_v61  ;;  %v1474_v63 = vmul.f32 %v2178_v35, %v1458_v45 }
 0xbc6   : > { %1487 = vst.msk [vmem:[#allocation2] sm:$0xff] %vm620_vm2, %v1485_v62  ;;  %v1480_v0 = vmul.f32 %v1478_v55, %v1474_v63  ;;  %1491 = sbr.rel (%p1842_p2) target bundleno = 3442 (0xd72), region = 130 }
 0xbc8   : > { %v1486_v1 = vadd.f32 %v1484_v59, %v1480_v0 }
 0xbca   : > { %1488 = vst.msk [vmem:[#allocation2 + $0x8] sm:$0xff] %vm620_vm2, %v1486_v1 }
 0xbcb   : > { %2419 = dma.done.wait [#allocation5 + $0x1], 256 }
 0xbcc   : > { %2420 = vsyncadd [#allocation5 + $0x1], 4294967040 }
 0xbcd   : > { %2421 = dma.done.wait [#allocation5 + $0x2], 256 }
 0xbce   : > { %2422 = vsyncadd [#allocation5 + $0x2], 4294967040  ;;  %v1501_v39 = vpack.c.bf16 %v1486_v1, %v1486_v1  ;;  %v2459_v41 = vmov 0.0   ;;  %vm2460_vm9 = vmmov 0   ;;  %v1500_v36 = vpack.c.bf16 %v1485_v62, %v1485_v62  ;;  %v2179_v3 = vld [vmem:[#allocation3 + $0x8] sm:$0xff]   ;;  %v2180_v4 = vld [vmem:[#allocation3] sm:$0xff]  }
 0xbcf   : > { %2007 = vmatprep.subr.bf16.mxu0 %v2459_v41  ;;  %2011 = vmatprep.mubr.msk.bf16.mxu0 %vm2460_vm9, %v2459_v41  ;;  %vm1518_vm10 = vcmask 1041409   ;;  %v2181_v7 = vld [vmem:[#allocation4 + $0x8] sm:$0xff]   ;;  %v2182_v8 = vld [vmem:[#allocation4] sm:$0xff]  }
 0xbd0   : > { %v1516_v57 = vunpack.c.l.b16 %v1501_v39  ;;  %2015 = vmatprep.subr.bf16.mxu1 %v2459_v41  ;;  %2019 = vmatprep.mubr.msk.bf16.mxu1 %vm2460_vm9, %v2459_v41  ;;  %v1515_v58 = vunpack.c.l.b16 %v1500_v36  ;;  %v1868_v9 = vld [vmem:[#allocation12] ss:$0 sm:$0xff]  ;;  %v1872_v19 = vld [vmem:[#allocation13] ss:$0 sm:$0xff] }
 0xbd1   : > { %2008 = vmatpush3.bf16.msra.mxu0 %v2179_v3  ;;  %2016 = vmatpush3.bf16.msra.mxu1 %v2181_v7 }
 0xbd2   : > { %v1517_v2 = vrot.slane %v1516_v57, 7  ;;  %2009 = vmatprep.subr.bf16.mxu0 %v2459_v41  ;;  %2017 = vmatprep.subr.bf16.mxu1 %v2459_v41 }
 0xbd4   : > { %v1519_v5 = vsel %vm1518_vm10, %v1517_v2, %v1515_v58 }
 0xbd5   : > { %v1520_v6 = vpack.c.b16 %v1519_v5, %v1519_v5  ;;  %2010 = vmatpush3.bf16.msra.mxu0 %v2180_v4  ;;  %2018 = vmatpush3.bf16.msra.mxu1 %v2182_v8 }
 0xbd8   : > { %2012 = vmatmul.mubr.msk.bf16.vlgmr.msra.gmra.mxu0 %vm620_vm2, %v1520_v6 }
 0xc98   : > { %v1570_v10 = vpop.f32.mrf.mxu0 }
 0xc99   : > { %v1571_v11 = vadd.f32 %v1868_v9, %v1570_v10 }
 0xc9a   : > { %v2013_v12 = vpop.f32.mrf.mxu0 }
 0xc9b   : > { %2183 = vtanh.f32 %v1571_v11 }
 0xc9c   : > { %v1573_v13 = vpop.f32.mrf.mxu0 }
 0xc9e   : > { %v2014_v14 = vpop.f32.mrf.mxu0 }
 0xca8   : > { %v2184_v15 = vpop.eup %2183 }
 0xca9   : > { %v1577_v18 = vpack.c.bf16 %v2184_v15, %v2184_v15 }
 0xcab   : > { %2020 = vmatmul.mubr.msk.bf16.vlgmr.msra.gmra.mxu1 %vm620_vm2, %v1577_v18 }
 0xd6b   : > { %v1638_v20 = vpop.f32.mrf.mxu1 }
 0xd6c   : > { %v1639_v21 = vadd.f32 %v1872_v19, %v1638_v20 }
 0xd6d   : > { %v2021_v22 = vpop.f32.mrf.mxu1 }
 0xd6e   : > { %1644 = vst [vmem:[#allocation15] sm:$0x3] %v1639_v21 }
 0xd6f   : > { %v1641_v23 = vpop.f32.mrf.mxu1 }
 0xd71   : > { %v2022_v24 = vpop.f32.mrf.mxu1 }
 0xd72 PF: > { %p2071_p8 = scmp.eq.s32.totalorder %s2548_s27, 1  ;;  %s2461_s14 = smov [#allocation15]  }
 0xd73   : > { %s1652_s29 = sshll.u32 %s2461_s14, 4  ;;  %s1653_s29 = int_to_ptr.vmem [resolvable:$true] %s1652_s29 }
 0xd74   : > { %s2357_s2 = scalar_lea.vmem %s1653_s29, 32  ;;  %p2364_p0 = scmp.lt.s32.totalorder %s1653_s29, %s1653_s29 }
 0xd75   : > { %p2358_p9 = scmp.ne.s32.totalorder %s1653_s29, %s2357_s2  ;;  %p2365_p3 = scmp.lt.s32.totalorder %s2357_s2, %s2357_s2 }
 0xd77   : > { %p2359_p11 = pnand %p2358_p9, %p2071_p8  ;;  %p2366_p7 = por %p2365_p3, %p2364_p0 }
 0xd79   : > { %p2360_p12 = pneg %p2359_p11 }
 0xd7b   : > { %p2367_p13 = pnand %p2366_p7, %p2360_p12 }
 0xd7d   : > { %2370 = shalt.err (!%p2367_p13)
}
 0xd7e   : > { %2042 = dma.vmem_to_hbm [thread:$0]  (%p2071_p8), %s1653_s29, 32, %s2921_s12, [#allocation8]  }
 0xd7f   : > { %2424 = dma.done.wait (%p2071_p8), [#allocation8], 32  }
 0xd80   : > { %2426 = vsyncadd (%p2071_p8), [#allocation8], 4294967264 }
 0xd81 PF: > { %p23_p2 = scmp.ge.s32.totalorder %s2609_s15, 4   ;;  %s2947_s21 = smov %s2433_s22 }
 0xd82   : > { %s2948_s22 = smov %s2437_s23  ;;  %s2949_s23 = smov %s2621_s16 }
 0xd83   : > { %s2950_s24 = smov %s2609_s15  ;;  %25 = sbr.rel (!%p23_p2) target bundleno = 9 (0x9), region = 188 }
 0xd88   :  { %1665 = vsyncpa [#allocation7], 1 }
 0xd89   :  { %1667 = vsyncpa [#allocation7 + $0x1], 1 }
 0xd8a   :  { %1668 = vsyncpa [#allocation10], 1 }
 0xd8b   :  { %1669 = vsyncpa [#allocation14], 1 }
 0xd8c   :  { %1670 = vsyncpa [#allocation8], 1 }
 0xd8d   :  { %1672 = vsyncpa [#allocation8 + $0x1], 1 }
 0xd8e   :  { %1673 = vsyncmov [#allocation5] }
 0xd91   :  { %s1674_s27 = vpop.sfrf %1673 }
 0xd92   :  { %p1880_p5 = scmp.ne.s32.totalorder %s1674_s27, 0 }
 0xd94   :  { %1678 = shalt.err (%p1880_p5)  }
 0xd95   :  { %1680 = vsyncmov [#allocation5 + $0x1] }
 0xd98   :  { %s1681_s1 = vpop.sfrf %1680 }
 0xd99   :  { %p1881_p1 = scmp.ne.s32.totalorder %s1681_s1, 0 }
 0xd9b   :  { %1685 = shalt.err (%p1881_p1)  }
 0xd9c   :  { %1687 = vsyncmov [#allocation5 + $0x2] }
 0xd9f   :  { %s1688_s28 = vpop.sfrf %1687 }
 0xda0   :  { %p1882_p4 = scmp.ne.s32.totalorder %s1688_s28, 0 }
 0xda2   :  { %1692 = shalt.err (%p1882_p4)  }

</bundles_post_ra>
